<compile_context>
chip_gen: v5e
topology: v5e:2x2
jax: 0.10.0
libtpu: 0.0.40
codegen_flags: <defaults>
</compile_context>

<pallas_src>
import numpy as np
import jax
import jax.numpy as jnp
from jax.experimental import pallas as pl
from jax.experimental.pallas import tpu as pltpu

NEG_SLOPE = 0.01  # torch.nn.functional.leaky_relu_ default negative_slope

_VMEM = pl.BlockSpec(memory_space=pltpu.MemorySpace.VMEM)


# --------------------------- in-kernel helpers --------------------------------

def _leaky(y):
    return jnp.maximum(y, NEG_SLOPE * y)


def _gru_cell(x, h, wih, whh, bih, bhh, m, H):
    """One GRU cell step, PyTorch gate order (r, z, n), packed-seq masking.

    wih: (din, 3H), whh: (H, 3H), biases (1, 3H); m: (B, 1) validity mask.
    Returns (h_new, out) where out is the packed output (zero past length) and
    h_new is the hidden state (frozen past length).
    """
    gi = jnp.dot(x, wih, preferred_element_type=jnp.float32) + bih   # (B, 3H)
    gh = jnp.dot(h, whh, preferred_element_type=jnp.float32) + bhh   # (B, 3H)
    r = jax.nn.sigmoid(gi[:, 0:H] + gh[:, 0:H])
    z = jax.nn.sigmoid(gi[:, H:2 * H] + gh[:, H:2 * H])
    n = jnp.tanh(gi[:, 2 * H:3 * H] + r * gh[:, 2 * H:3 * H])
    h_cand = (1.0 - z) * n + z * h
    out = m * h_cand              # pad_packed_sequence pads with zeros
    h_new = out + (1.0 - m) * h   # freeze hidden state past sequence length
    return h_new, out


# --------------------------- fused encoder kernel -----------------------------

def _make_encoder_kernel(depth, H):
    def kernel(*refs):
        x_ref, len_ref = refs[0], refs[1]
        w_refs = refs[2:2 + 4 * depth]
        h_out_ref = refs[2 + 4 * depth]          # (depth, B, H) — doubles as state
        T = x_ref.shape[0]
        lens = len_ref[...]                      # (B, 1) f32, single VMEM load
        # Weights stay resident for the whole sequence (loaded once).
        W = [tuple(w_refs[4 * L + k][...] for k in range(4)) for L in range(depth)]
        h_out_ref[...] = jnp.zeros_like(h_out_ref)   # PyTorch default h0 = 0
        for t in range(T):                       # static unroll (T <= max_len)
            m = (lens > float(t)).astype(jnp.float32)   # (B, 1) validity mask
            x = x_ref[t]                         # (B, Din)
            for L in range(depth):
                wih, whh, bih, bhh = W[L]
                h_new, _ = _gru_cell(x, h_out_ref[L], wih, whh, bih, bhh, m, H)
                h_out_ref[L] = h_new
                x = h_new                        # feed next layer (mask-safe)
    return kernel


def encoder_forward(x_seq, lengths_f, layer_weights):
    """x_seq: (T,B,Din); lengths_f: (B,1) f32; layer_weights: 4*depth arrays."""
    depth = len(layer_weights) // 4
    T, B, _ = x_seq.shape
    H = layer_weights[1].shape[0]                # whh: (H, 3H)
    return pl.pallas_call(
        _make_encoder_kernel(depth, H),
        out_shape=jax.ShapeDtypeStruct((depth, B, H), jnp.float32),
        in_specs=[_VMEM] * (2 + 4 * depth),
        out_specs=_VMEM,
    )(x_seq, lengths_f, *layer_weights)


# --------------------------- fused decoder kernel -----------------------------

def _make_decoder_kernel(depth, H):
    def kernel(*refs):
        x_ref, len_ref, ench_ref, midw_ref, midb_ref = refs[:5]
        w_refs = refs[5:5 + 4 * depth]
        l1w_ref, l1b_ref, l2w_ref, l2b_ref = refs[5 + 4 * depth:9 + 4 * depth]
        score_ref = refs[9 + 4 * depth]          # (T, B, Vpad) output
        h_ref = refs[10 + 4 * depth]             # VMEM scratch (depth, B, H)
        T = x_ref.shape[0]
        lens = len_ref[...]
        midw, midb = midw_ref[...], midb_ref[...]
        l1w, l1b = l1w_ref[...], l1b_ref[...]
        l2w, l2b = l2w_ref[...], l2b_ref[...]
        W = [tuple(w_refs[4 * L + k][...] for k in range(4)) for L in range(depth)]
        # Decoder.to_middle: Linear + leaky_relu_ on the (already permuted) encoder h.
        for L in range(depth):
            y = jnp.dot(ench_ref[L], midw, preferred_element_type=jnp.float32) + midb
            h_ref[L] = _leaky(y)
        for t in range(T):
            m = (lens > float(t)).astype(jnp.float32)
            x = x_ref[t]
            out = None
            for L in range(depth):
                wih, whh, bih, bhh = W[L]
                h_new, out = _gru_cell(x, h_ref[L], wih, whh, bih, bhh, m, H)
                h_ref[L] = h_new
                x = h_new
            # l1 + leaky_relu + l2 head on the zero-padded top-layer output
            # (matches PyTorch applying the head to pad_packed zeros).
            y = _leaky(jnp.dot(out, l1w, preferred_element_type=jnp.float32) + l1b)
            score_ref[t] = jnp.dot(y, l2w, preferred_element_type=jnp.float32) + l2b
    return kernel


def decoder_forward(x_seq, lengths_f, enc_h, midw, midb, layer_weights,
                    l1w, l1b, l2w_pad, l2b_pad):
    depth = len(layer_weights) // 4
    T, B, _ = x_seq.shape
    H = midw.shape[0]
    Vpad = l2w_pad.shape[1]
    n_in = 9 + 4 * depth
    return pl.pallas_call(
        _make_decoder_kernel(depth, H),
        out_shape=jax.ShapeDtypeStruct((T, B, Vpad), jnp.float32),
        in_specs=[_VMEM] * n_in,
        out_specs=_VMEM,
        scratch_shapes=[pltpu.VMEM((depth, B, H), jnp.float32)],
    )(x_seq, lengths_f, enc_h, midw, midb, *layer_weights, l1w, l1b, l2w_pad, l2b_pad)


# --------------------------- host-side model glue ------------------------------

def pad_and_sort(tokens_list, trees_list, max_len):
    """GenModel.pad_list: pad, truncate, sort by length desc, transpose to (T, B)."""
    B = len(tokens_list)
    lengths = np.array([len(t) for t in tokens_list], dtype=np.int64)
    L = int(lengths.max())
    tok = np.zeros((B, L), dtype=np.int64)
    tre = np.zeros((B, L, 4), dtype=np.float32)
    for i, l in enumerate(lengths):
        tok[i, :l] = tokens_list[i]
        tre[i, :l, :] = trees_list[i]
    if L > max_len:
        tok = tok[:, :max_len]
        tre = tre[:, :max_len, :]
        lengths = np.minimum(lengths, max_len)
    perm = np.argsort(-lengths, kind="stable")          # torch.sort(descending=True)
    tok = tok[perm].T                                   # (T, B)
    tre = tre[perm].transpose(1, 0, 2)                  # (T, B, 4)
    return (jnp.asarray(tok, dtype=jnp.int32), jnp.asarray(tre),
            jnp.asarray(perm, dtype=jnp.int32),
            jnp.asarray(lengths[perm], dtype=jnp.int32))


def embed(params, tok, tre):
    """Emb.forward: embedding lookup + concat(tree * 0.1)."""
    x = jnp.take(params["emb_w"], tok, axis=0)          # (T, B, nFeats)
    return jnp.concatenate([x, tre * 0.1], axis=2)      # structure_data_scaling


def gen_model_forward(params, batch, args):
    in_tokens, in_trees, out_tokens, out_trees = batch
    vocab = args["vocab_size"]

    # GenModel.embed
    in_tok, in_tre, in_perm, in_len = pad_and_sort(in_tokens, in_trees, args["max_len"])
    out_tok, out_tre, out_perm, out_len = pad_and_sort(out_tokens, out_trees, args["max_len"])
    in_feats = embed(params, in_tok, in_tre)
    out_feats = embed(params, out_tok, out_tre)

    # GenModel.encode — one fused kernel over all timesteps & layers.
    enc_h = encoder_forward(in_feats, in_len.astype(jnp.float32)[:, None],
                            params["encoder"])
    in_unperm = jnp.argsort(in_perm)
    # encode() unperm, then Decoder h = h[:, out_perm, :]
    enc_h_dec = enc_h[:, in_unperm, :][:, out_perm, :]

    # Decoder — to_middle + GRU + l1/leaky/l2 head, one fused kernel.
    score_pad = decoder_forward(out_feats, out_len.astype(jnp.float32)[:, None],
                                enc_h_dec, params["mid_wt"], params["mid_b"],
                                params["decoder_gru"],
                                params["l1_wt"], params["l1_b"],
                                params["l2_wt_pad"], params["l2_b_pad"])
    score = score_pad[:, :, :vocab].transpose(1, 0, 2)  # (B, T_out, V)
    out_unperm = jnp.argsort(out_perm)
    return score[out_unperm]


# --------------------------- Parameter init -----------------------------------

def init_params(key, nfeats, vocab, depth, use_tree=True):
    in_dim = nfeats + 4 if use_tree else nfeats
    k = 1.0 / np.sqrt(nfeats)
    keys = iter(jax.random.split(key, 64))

    def u(shape, scale=k):
        return jax.random.uniform(next(keys), shape, jnp.float32, -scale, scale)

    def gru_params(input_size, layers):
        ws = []
        for layer in range(layers):
            din = input_size if layer == 0 else nfeats
            ws += [u((din, 3 * nfeats)),      # W_ih^T, gate blocks [r|z|n]
                   u((nfeats, 3 * nfeats)),   # W_hh^T
                   u((1, 3 * nfeats)),        # b_ih
                   u((1, 3 * nfeats))]        # b_hh
        return ws

    kaiming = np.sqrt(2.0 / nfeats)
    vpad = ((vocab + 127) // 128) * 128       # lane-dense head output
    l2_wt = u((nfeats, vocab))
    l2_b = u((1, vocab))
    l2_wt_pad = jnp.zeros((nfeats, vpad), jnp.float32).at[:, :vocab].set(l2_wt)
    l2_b_pad = jnp.zeros((1, vpad), jnp.float32).at[:, :vocab].set(l2_b)
    return dict(
        emb_w=jax.random.normal(next(keys), (vocab, nfeats), jnp.float32) * kaiming,
        encoder=gru_params(in_dim, depth),
        decoder_gru=gru_params(in_dim, depth),
        mid_wt=jax.random.normal(next(keys), (nfeats, nfeats), jnp.float32) * kaiming,
        mid_b=u((1, nfeats)),
        l1_wt=u((nfeats, nfeats)), l1_b=u((1, nfeats)),
        l2_wt_pad=l2_wt_pad, l2_b_pad=l2_b_pad,
    )


# --------------------------- Main ---------------------------------------------

if __name__ == "__main__":
    args = dict(nFeats=32, vocab_size=48, gru_depth=2, max_len=16)

    key = jax.random.PRNGKey(0)
    params = init_params(key, args["nFeats"], args["vocab_size"], args["gru_depth"])

    # Deterministic synthetic batch: 2 variable-length sequences per side.
    rng = np.random.default_rng(0)

    def make_seqs(lengths):
        toks, trees = [], []
        for L in lengths:
            toks.append(rng.integers(1, args["vocab_size"], size=(L,)).astype(np.int64))
            trees.append(rng.standard_normal((L, 4)).astype(np.float32))
        return toks, trees

    in_tokens, in_trees = make_seqs([5, 3])
    out_tokens, out_trees = make_seqs([6, 4])

    score = gen_model_forward(params,
                              (in_tokens, in_trees, out_tokens, out_trees),
                              args)
    score = jax.block_until_ready(score)

    assert score.shape == (2, 6, args["vocab_size"]), score.shape
    assert bool(jnp.all(jnp.isfinite(score)))
    # TODO(synk): training-time inter-layer GRU dropout not modeled (inference semantics).
    print("KERNEL_OK")
</pallas_src>

<mosaic_0001>
module attributes {stable_mosaic.version = 11 : i64} {
  func.func @kernel(%arg0: memref<5x2x36xf32, #tpu.memory_space<vmem>>, %arg1: memref<2x1xf32, #tpu.memory_space<vmem>>, %arg2: memref<36x96xf32, #tpu.memory_space<vmem>>, %arg3: memref<32x96xf32, #tpu.memory_space<vmem>>, %arg4: memref<1x96xf32, #tpu.memory_space<vmem>>, %arg5: memref<1x96xf32, #tpu.memory_space<vmem>>, %arg6: memref<32x96xf32, #tpu.memory_space<vmem>>, %arg7: memref<32x96xf32, #tpu.memory_space<vmem>>, %arg8: memref<1x96xf32, #tpu.memory_space<vmem>>, %arg9: memref<1x96xf32, #tpu.memory_space<vmem>>, %arg10: memref<2x2x32xf32, #tpu.memory_space<vmem>>) attributes {dimension_semantics = [], scalar_prefetch = 0 : i64, scratch_operands = 0 : i64, tpu.core_type = #tpu.core_type<tc>} {
    %c0 = arith.constant 0 : index
    %c0_0 = arith.constant 0 : index
    %0 = vector.load %arg1[%c0, %c0_0] : memref<2x1xf32, #tpu.memory_space<vmem>>, vector<2x1xf32>
    %c0_1 = arith.constant 0 : index
    %c0_2 = arith.constant 0 : index
    %1 = vector.load %arg2[%c0_1, %c0_2] : memref<36x96xf32, #tpu.memory_space<vmem>>, vector<36x96xf32>
    %c0_3 = arith.constant 0 : index
    %c0_4 = arith.constant 0 : index
    %2 = vector.load %arg3[%c0_3, %c0_4] : memref<32x96xf32, #tpu.memory_space<vmem>>, vector<32x96xf32>
    %c0_5 = arith.constant 0 : index
    %c0_6 = arith.constant 0 : index
    %3 = vector.load %arg4[%c0_5, %c0_6] : memref<1x96xf32, #tpu.memory_space<vmem>>, vector<1x96xf32>
    %c0_7 = arith.constant 0 : index
    %c0_8 = arith.constant 0 : index
    %4 = vector.load %arg5[%c0_7, %c0_8] : memref<1x96xf32, #tpu.memory_space<vmem>>, vector<1x96xf32>
    %c0_9 = arith.constant 0 : index
    %c0_10 = arith.constant 0 : index
    %5 = vector.load %arg6[%c0_9, %c0_10] : memref<32x96xf32, #tpu.memory_space<vmem>>, vector<32x96xf32>
    %c0_11 = arith.constant 0 : index
    %c0_12 = arith.constant 0 : index
    %6 = vector.load %arg7[%c0_11, %c0_12] : memref<32x96xf32, #tpu.memory_space<vmem>>, vector<32x96xf32>
    %c0_13 = arith.constant 0 : index
    %c0_14 = arith.constant 0 : index
    %7 = vector.load %arg8[%c0_13, %c0_14] : memref<1x96xf32, #tpu.memory_space<vmem>>, vector<1x96xf32>
    %c0_15 = arith.constant 0 : index
    %c0_16 = arith.constant 0 : index
    %8 = vector.load %arg9[%c0_15, %c0_16] : memref<1x96xf32, #tpu.memory_space<vmem>>, vector<1x96xf32>
    %cst = arith.constant 0.000000e+00 : f32
    %9 = vector.broadcast %cst : f32 to vector<2x2x32xf32>
    %c0_17 = arith.constant 0 : index
    %c0_18 = arith.constant 0 : index
    %c0_19 = arith.constant 0 : index
    %10 = vector.load %arg10[%c0_17, %c0_18, %c0_19] : memref<2x2x32xf32, #tpu.memory_space<vmem>>, vector<2x2x32xf32>
    tpu.vector_store %arg10[%c0_17, %c0_18, %c0_19], %9 {strides = array<i32>} : memref<2x2x32xf32, #tpu.memory_space<vmem>>, vector<2x2x32xf32>,
    %cst_20 = arith.constant 0.000000e+00 : f32
    %11 = vector.broadcast %cst_20 : f32 to vector<2x1xf32>
    %12 = arith.cmpf ogt, %0, %11 : vector<2x1xf32>
    %13 = arith.extui %12 : vector<2x1xi1> to vector<2x1xi32>
    %14 = arith.sitofp %13 : vector<2x1xi32> to vector<2x1xf32>
    %c0_21 = arith.constant 0 : index
    %c0_22 = arith.constant 0 : index
    %c0_23 = arith.constant 0 : index
    %15 = vector.load %arg0[%c0_21, %c0_22, %c0_23] : memref<5x2x36xf32, #tpu.memory_space<vmem>>, vector<1x2x36xf32>
    %16 = vector.shape_cast %15 : vector<1x2x36xf32> to vector<2x36xf32>
    %c0_24 = arith.constant 0 : index
    %c0_25 = arith.constant 0 : index
    %c0_26 = arith.constant 0 : index
    %17 = vector.load %arg10[%c0_24, %c0_25, %c0_26] : memref<2x2x32xf32, #tpu.memory_space<vmem>>, vector<1x2x32xf32>
    %18 = vector.shape_cast %17 : vector<1x2x32xf32> to vector<2x32xf32>
    %cst_27 = arith.constant dense<0.000000e+00> : vector<2x96xf32>
    %19 = tpu.matmul %16, %1, %cst_27 {dimension_numbers = #tpu.dot_dimension_numbers<[1], [0], [0], [1], [0, 0, 1, 1], [], []>} : vector<2x36xf32>, vector<36x96xf32>, vector<2x96xf32> -> vector<2x96xf32>
    %20 = vector.broadcast %3 : vector<1x96xf32> to vector<2x96xf32>
    %21 = arith.addf %19, %20 : vector<2x96xf32>
    %cst_28 = arith.constant dense<0.000000e+00> : vector<2x96xf32>
    %22 = tpu.matmul %18, %2, %cst_28 {dimension_numbers = #tpu.dot_dimension_numbers<[1], [0], [0], [1], [0, 0, 1, 1], [], []>} : vector<2x32xf32>, vector<32x96xf32>, vector<2x96xf32> -> vector<2x96xf32>
    %23 = vector.broadcast %4 : vector<1x96xf32> to vector<2x96xf32>
    %24 = arith.addf %22, %23 : vector<2x96xf32>
    %25 = vector.extract_strided_slice %21 {offsets = [0, 0], sizes = [2, 32], strides = [1, 1]} : vector<2x96xf32> to vector<2x32xf32>
    %26 = vector.extract_strided_slice %24 {offsets = [0, 0], sizes = [2, 32], strides = [1, 1]} : vector<2x96xf32> to vector<2x32xf32>
    %27 = arith.addf %25, %26 : vector<2x32xf32>
    %28 = arith.negf %27 : vector<2x32xf32>
    %29 = math.exp %28 : vector<2x32xf32>
    %cst_29 = arith.constant 1.000000e+00 : f32
    %30 = vector.broadcast %cst_29 : f32 to vector<2x32xf32>
    %31 = arith.addf %30, %29 : vector<2x32xf32>
    %32 = arith.divf %30, %31 : vector<2x32xf32>
    %33 = vector.extract_strided_slice %21 {offsets = [0, 32], sizes = [2, 32], strides = [1, 1]} : vector<2x96xf32> to vector<2x32xf32>
    %34 = vector.extract_strided_slice %24 {offsets = [0, 32], sizes = [2, 32], strides = [1, 1]} : vector<2x96xf32> to vector<2x32xf32>
    %35 = arith.addf %33, %34 : vector<2x32xf32>
    %36 = arith.negf %35 : vector<2x32xf32>
    %37 = math.exp %36 : vector<2x32xf32>
    %cst_30 = arith.constant 1.000000e+00 : f32
    %38 = vector.broadcast %cst_30 : f32 to vector<2x32xf32>
    %39 = arith.addf %38, %37 : vector<2x32xf32>
    %40 = arith.divf %38, %39 : vector<2x32xf32>
    %41 = vector.extract_strided_slice %21 {offsets = [0, 64], sizes = [2, 32], strides = [1, 1]} : vector<2x96xf32> to vector<2x32xf32>
    %42 = vector.extract_strided_slice %24 {offsets = [0, 64], sizes = [2, 32], strides = [1, 1]} : vector<2x96xf32> to vector<2x32xf32>
    %43 = arith.mulf %32, %42 : vector<2x32xf32>
    %44 = arith.addf %41, %43 : vector<2x32xf32>
    %45 = math.tanh %44 : vector<2x32xf32>
    %cst_31 = arith.constant 1.000000e+00 : f32
    %46 = vector.broadcast %cst_31 : f32 to vector<2x32xf32>
    %47 = arith.subf %46, %40 : vector<2x32xf32>
    %48 = arith.mulf %47, %45 : vector<2x32xf32>
    %49 = arith.mulf %40, %18 : vector<2x32xf32>
    %50 = arith.addf %48, %49 : vector<2x32xf32>
    %51 = vector.broadcast %14 : vector<2x1xf32> to vector<2x32xf32>
    %52 = arith.mulf %51, %50 : vector<2x32xf32>
    %cst_32 = arith.constant 1.000000e+00 : f32
    %53 = vector.broadcast %cst_32 : f32 to vector<2x1xf32>
    %54 = arith.subf %53, %14 : vector<2x1xf32>
    %55 = vector.broadcast %54 : vector<2x1xf32> to vector<2x32xf32>
    %56 = arith.mulf %55, %18 : vector<2x32xf32>
    %57 = arith.addf %52, %56 : vector<2x32xf32>
    %c0_33 = arith.constant 0 : index
    %c0_34 = arith.constant 0 : index
    %c0_35 = arith.constant 0 : index
    %58 = vector.load %arg10[%c0_33, %c0_34, %c0_35] : memref<2x2x32xf32, #tpu.memory_space<vmem>>, vector<1x2x32xf32>
    %59 = vector.shape_cast %58 : vector<1x2x32xf32> to vector<2x32xf32>
    %60 = vector.shape_cast %57 : vector<2x32xf32> to vector<1x2x32xf32>
    tpu.vector_store %arg10[%c0_33, %c0_34, %c0_35], %60 {strides = array<i32>} : memref<2x2x32xf32, #tpu.memory_space<vmem>>, vector<1x2x32xf32>,
    %c1 = arith.constant 1 : index
    %c0_36 = arith.constant 0 : index
    %c0_37 = arith.constant 0 : index
    %61 = vector.load %arg10[%c1, %c0_36, %c0_37] : memref<2x2x32xf32, #tpu.memory_space<vmem>>, vector<1x2x32xf32>
    %62 = vector.shape_cast %61 : vector<1x2x32xf32> to vector<2x32xf32>
    %cst_38 = arith.constant dense<0.000000e+00> : vector<2x96xf32>
    %63 = tpu.matmul %57, %5, %cst_38 {dimension_numbers = #tpu.dot_dimension_numbers<[1], [0], [0], [1], [0, 0, 1, 1], [], []>} : vector<2x32xf32>, vector<32x96xf32>, vector<2x96xf32> -> vector<2x96xf32>
    %64 = vector.broadcast %7 : vector<1x96xf32> to vector<2x96xf32>
    %65 = arith.addf %63, %64 : vector<2x96xf32>
    %cst_39 = arith.constant dense<0.000000e+00> : vector<2x96xf32>
    %66 = tpu.matmul %62, %6, %cst_39 {dimension_numbers = #tpu.dot_dimension_numbers<[1], [0], [0], [1], [0, 0, 1, 1], [], []>} : vector<2x32xf32>, vector<32x96xf32>, vector<2x96xf32> -> vector<2x96xf32>
    %67 = vector.broadcast %8 : vector<1x96xf32> to vector<2x96xf32>
    %68 = arith.addf %66, %67 : vector<2x96xf32>
    %69 = vector.extract_strided_slice %65 {offsets = [0, 0], sizes = [2, 32], strides = [1, 1]} : vector<2x96xf32> to vector<2x32xf32>
    %70 = vector.extract_strided_slice %68 {offsets = [0, 0], sizes = [2, 32], strides = [1, 1]} : vector<2x96xf32> to vector<2x32xf32>
    %71 = arith.addf %69, %70 : vector<2x32xf32>
    %72 = arith.negf %71 : vector<2x32xf32>
    %73 = math.exp %72 : vector<2x32xf32>
    %cst_40 = arith.constant 1.000000e+00 : f32
    %74 = vector.broadcast %cst_40 : f32 to vector<2x32xf32>
    %75 = arith.addf %74, %73 : vector<2x32xf32>
    %76 = arith.divf %74, %75 : vector<2x32xf32>
    %77 = vector.extract_strided_slice %65 {offsets = [0, 32], sizes = [2, 32], strides = [1, 1]} : vector<2x96xf32> to vector<2x32xf32>
    %78 = vector.extract_strided_slice %68 {offsets = [0, 32], sizes = [2, 32], strides = [1, 1]} : vector<2x96xf32> to vector<2x32xf32>
    %79 = arith.addf %77, %78 : vector<2x32xf32>
    %80 = arith.negf %79 : vector<2x32xf32>
    %81 = math.exp %80 : vector<2x32xf32>
    %cst_41 = arith.constant 1.000000e+00 : f32
    %82 = vector.broadcast %cst_41 : f32 to vector<2x32xf32>
    %83 = arith.addf %82, %81 : vector<2x32xf32>
    %84 = arith.divf %82, %83 : vector<2x32xf32>
    %85 = vector.extract_strided_slice %65 {offsets = [0, 64], sizes = [2, 32], strides = [1, 1]} : vector<2x96xf32> to vector<2x32xf32>
    %86 = vector.extract_strided_slice %68 {offsets = [0, 64], sizes = [2, 32], strides = [1, 1]} : vector<2x96xf32> to vector<2x32xf32>
    %87 = arith.mulf %76, %86 : vector<2x32xf32>
    %88 = arith.addf %85, %87 : vector<2x32xf32>
    %89 = math.tanh %88 : vector<2x32xf32>
    %cst_42 = arith.constant 1.000000e+00 : f32
    %90 = vector.broadcast %cst_42 : f32 to vector<2x32xf32>
    %91 = arith.subf %90, %84 : vector<2x32xf32>
    %92 = arith.mulf %91, %89 : vector<2x32xf32>
    %93 = arith.mulf %84, %62 : vector<2x32xf32>
    %94 = arith.addf %92, %93 : vector<2x32xf32>
    %95 = vector.broadcast %14 : vector<2x1xf32> to vector<2x32xf32>
    %96 = arith.mulf %95, %94 : vector<2x32xf32>
    %cst_43 = arith.constant 1.000000e+00 : f32
    %97 = vector.broadcast %cst_43 : f32 to vector<2x1xf32>
    %98 = arith.subf %97, %14 : vector<2x1xf32>
    %99 = vector.broadcast %98 : vector<2x1xf32> to vector<2x32xf32>
    %100 = arith.mulf %99, %62 : vector<2x32xf32>
    %101 = arith.addf %96, %100 : vector<2x32xf32>
    %c1_44 = arith.constant 1 : index
    %c0_45 = arith.constant 0 : index
    %c0_46 = arith.constant 0 : index
    %102 = vector.load %arg10[%c1_44, %c0_45, %c0_46] : memref<2x2x32xf32, #tpu.memory_space<vmem>>, vector<1x2x32xf32>
    %103 = vector.shape_cast %102 : vector<1x2x32xf32> to vector<2x32xf32>
    %104 = vector.shape_cast %101 : vector<2x32xf32> to vector<1x2x32xf32>
    tpu.vector_store %arg10[%c1_44, %c0_45, %c0_46], %104 {strides = array<i32>} : memref<2x2x32xf32, #tpu.memory_space<vmem>>, vector<1x2x32xf32>,
    %cst_47 = arith.constant 1.000000e+00 : f32
    %105 = vector.broadcast %cst_47 : f32 to vector<2x1xf32>
    %106 = arith.cmpf ogt, %0, %105 : vector<2x1xf32>
    %107 = arith.extui %106 : vector<2x1xi1> to vector<2x1xi32>
    %108 = arith.sitofp %107 : vector<2x1xi32> to vector<2x1xf32>
    %c1_48 = arith.constant 1 : index
    %c0_49 = arith.constant 0 : index
    %c0_50 = arith.constant 0 : index
    %109 = vector.load %arg0[%c1_48, %c0_49, %c0_50] : memref<5x2x36xf32, #tpu.memory_space<vmem>>, vector<1x2x36xf32>
    %110 = vector.shape_cast %109 : vector<1x2x36xf32> to vector<2x36xf32>
    %c0_51 = arith.constant 0 : index
    %c0_52 = arith.constant 0 : index
    %c0_53 = arith.constant 0 : index
    %111 = vector.load %arg10[%c0_51, %c0_52, %c0_53] : memref<2x2x32xf32, #tpu.memory_space<vmem>>, vector<1x2x32xf32>
    %112 = vector.shape_cast %111 : vector<1x2x32xf32> to vector<2x32xf32>
    %cst_54 = arith.constant dense<0.000000e+00> : vector<2x96xf32>
    %113 = tpu.matmul %110, %1, %cst_54 {dimension_numbers = #tpu.dot_dimension_numbers<[1], [0], [0], [1], [0, 0, 1, 1], [], []>} : vector<2x36xf32>, vector<36x96xf32>, vector<2x96xf32> -> vector<2x96xf32>
    %114 = vector.broadcast %3 : vector<1x96xf32> to vector<2x96xf32>
    %115 = arith.addf %113, %114 : vector<2x96xf32>
    %cst_55 = arith.constant dense<0.000000e+00> : vector<2x96xf32>
    %116 = tpu.matmul %112, %2, %cst_55 {dimension_numbers = #tpu.dot_dimension_numbers<[1], [0], [0], [1], [0, 0, 1, 1], [], []>} : vector<2x32xf32>, vector<32x96xf32>, vector<2x96xf32> -> vector<2x96xf32>
    %117 = vector.broadcast %4 : vector<1x96xf32> to vector<2x96xf32>
    %118 = arith.addf %116, %117 : vector<2x96xf32>
    %119 = vector.extract_strided_slice %115 {offsets = [0, 0], sizes = [2, 32], strides = [1, 1]} : vector<2x96xf32> to vector<2x32xf32>
    %120 = vector.extract_strided_slice %118 {offsets = [0, 0], sizes = [2, 32], strides = [1, 1]} : vector<2x96xf32> to vector<2x32xf32>
    %121 = arith.addf %119, %120 : vector<2x32xf32>
    %122 = arith.negf %121 : vector<2x32xf32>
    %123 = math.exp %122 : vector<2x32xf32>
    %cst_56 = arith.constant 1.000000e+00 : f32
    %124 = vector.broadcast %cst_56 : f32 to vector<2x32xf32>
    %125 = arith.addf %124, %123 : vector<2x32xf32>
    %126 = arith.divf %124, %125 : vector<2x32xf32>
    %127 = vector.extract_strided_slice %115 {offsets = [0, 32], sizes = [2, 32], strides = [1, 1]} : vector<2x96xf32> to vector<2x32xf32>
    %128 = vector.extract_strided_slice %118 {offsets = [0, 32], sizes = [2, 32], strides = [1, 1]} : vector<2x96xf32> to vector<2x32xf32>
    %129 = arith.addf %127, %128 : vector<2x32xf32>
    %130 = arith.negf %129 : vector<2x32xf32>
    %131 = math.exp %130 : vector<2x32xf32>
    %cst_57 = arith.constant 1.000000e+00 : f32
    %132 = vector.broadcast %cst_57 : f32 to vector<2x32xf32>
    %133 = arith.addf %132, %131 : vector<2x32xf32>
    %134 = arith.divf %132, %133 : vector<2x32xf32>
    %135 = vector.extract_strided_slice %115 {offsets = [0, 64], sizes = [2, 32], strides = [1, 1]} : vector<2x96xf32> to vector<2x32xf32>
    %136 = vector.extract_strided_slice %118 {offsets = [0, 64], sizes = [2, 32], strides = [1, 1]} : vector<2x96xf32> to vector<2x32xf32>
    %137 = arith.mulf %126, %136 : vector<2x32xf32>
    %138 = arith.addf %135, %137 : vector<2x32xf32>
    %139 = math.tanh %138 : vector<2x32xf32>
    %cst_58 = arith.constant 1.000000e+00 : f32
    %140 = vector.broadcast %cst_58 : f32 to vector<2x32xf32>
    %141 = arith.subf %140, %134 : vector<2x32xf32>
    %142 = arith.mulf %141, %139 : vector<2x32xf32>
    %143 = arith.mulf %134, %112 : vector<2x32xf32>
    %144 = arith.addf %142, %143 : vector<2x32xf32>
    %145 = vector.broadcast %108 : vector<2x1xf32> to vector<2x32xf32>
    %146 = arith.mulf %145, %144 : vector<2x32xf32>
    %cst_59 = arith.constant 1.000000e+00 : f32
    %147 = vector.broadcast %cst_59 : f32 to vector<2x1xf32>
    %148 = arith.subf %147, %108 : vector<2x1xf32>
    %149 = vector.broadcast %148 : vector<2x1xf32> to vector<2x32xf32>
    %150 = arith.mulf %149, %112 : vector<2x32xf32>
    %151 = arith.addf %146, %150 : vector<2x32xf32>
    %c0_60 = arith.constant 0 : index
    %c0_61 = arith.constant 0 : index
    %c0_62 = arith.constant 0 : index
    %152 = vector.load %arg10[%c0_60, %c0_61, %c0_62] : memref<2x2x32xf32, #tpu.memory_space<vmem>>, vector<1x2x32xf32>
    %153 = vector.shape_cast %152 : vector<1x2x32xf32> to vector<2x32xf32>
    %154 = vector.shape_cast %151 : vector<2x32xf32> to vector<1x2x32xf32>
    tpu.vector_store %arg10[%c0_60, %c0_61, %c0_62], %154 {strides = array<i32>} : memref<2x2x32xf32, #tpu.memory_space<vmem>>, vector<1x2x32xf32>,
    %c1_63 = arith.constant 1 : index
    %c0_64 = arith.constant 0 : index
    %c0_65 = arith.constant 0 : index
    %155 = vector.load %arg10[%c1_63, %c0_64, %c0_65] : memref<2x2x32xf32, #tpu.memory_space<vmem>>, vector<1x2x32xf32>
    %156 = vector.shape_cast %155 : vector<1x2x32xf32> to vector<2x32xf32>
    %cst_66 = arith.constant dense<0.000000e+00> : vector<2x96xf32>
    %157 = tpu.matmul %151, %5, %cst_66 {dimension_numbers = #tpu.dot_dimension_numbers<[1], [0], [0], [1], [0, 0, 1, 1], [], []>} : vector<2x32xf32>, vector<32x96xf32>, vector<2x96xf32> -> vector<2x96xf32>
    %158 = vector.broadcast %7 : vector<1x96xf32> to vector<2x96xf32>
    %159 = arith.addf %157, %158 : vector<2x96xf32>
    %cst_67 = arith.constant dense<0.000000e+00> : vector<2x96xf32>
    %160 = tpu.matmul %156, %6, %cst_67 {dimension_numbers = #tpu.dot_dimension_numbers<[1], [0], [0], [1], [0, 0, 1, 1], [], []>} : vector<2x32xf32>, vector<32x96xf32>, vector<2x96xf32> -> vector<2x96xf32>
    %161 = vector.broadcast %8 : vector<1x96xf32> to vector<2x96xf32>
    %162 = arith.addf %160, %161 : vector<2x96xf32>
    %163 = vector.extract_strided_slice %159 {offsets = [0, 0], sizes = [2, 32], strides = [1, 1]} : vector<2x96xf32> to vector<2x32xf32>
    %164 = vector.extract_strided_slice %162 {offsets = [0, 0], sizes = [2, 32], strides = [1, 1]} : vector<2x96xf32> to vector<2x32xf32>
    %165 = arith.addf %163, %164 : vector<2x32xf32>
    %166 = arith.negf %165 : vector<2x32xf32>
    %167 = math.exp %166 : vector<2x32xf32>
    %cst_68 = arith.constant 1.000000e+00 : f32
    %168 = vector.broadcast %cst_68 : f32 to vector<2x32xf32>
    %169 = arith.addf %168, %167 : vector<2x32xf32>
    %170 = arith.divf %168, %169 : vector<2x32xf32>
    %171 = vector.extract_strided_slice %159 {offsets = [0, 32], sizes = [2, 32], strides = [1, 1]} : vector<2x96xf32> to vector<2x32xf32>
    %172 = vector.extract_strided_slice %162 {offsets = [0, 32], sizes = [2, 32], strides = [1, 1]} : vector<2x96xf32> to vector<2x32xf32>
    %173 = arith.addf %171, %172 : vector<2x32xf32>
    %174 = arith.negf %173 : vector<2x32xf32>
    %175 = math.exp %174 : vector<2x32xf32>
    %cst_69 = arith.constant 1.000000e+00 : f32
    %176 = vector.broadcast %cst_69 : f32 to vector<2x32xf32>
    %177 = arith.addf %176, %175 : vector<2x32xf32>
    %178 = arith.divf %176, %177 : vector<2x32xf32>
    %179 = vector.extract_strided_slice %159 {offsets = [0, 64], sizes = [2, 32], strides = [1, 1]} : vector<2x96xf32> to vector<2x32xf32>
    %180 = vector.extract_strided_slice %162 {offsets = [0, 64], sizes = [2, 32], strides = [1, 1]} : vector<2x96xf32> to vector<2x32xf32>
    %181 = arith.mulf %170, %180 : vector<2x32xf32>
    %182 = arith.addf %179, %181 : vector<2x32xf32>
    %183 = math.tanh %182 : vector<2x32xf32>
    %cst_70 = arith.constant 1.000000e+00 : f32
    %184 = vector.broadcast %cst_70 : f32 to vector<2x32xf32>
    %185 = arith.subf %184, %178 : vector<2x32xf32>
    %186 = arith.mulf %185, %183 : vector<2x32xf32>
    %187 = arith.mulf %178, %156 : vector<2x32xf32>
    %188 = arith.addf %186, %187 : vector<2x32xf32>
    %189 = vector.broadcast %108 : vector<2x1xf32> to vector<2x32xf32>
    %190 = arith.mulf %189, %188 : vector<2x32xf32>
    %cst_71 = arith.constant 1.000000e+00 : f32
    %191 = vector.broadcast %cst_71 : f32 to vector<2x1xf32>
    %192 = arith.subf %191, %108 : vector<2x1xf32>
    %193 = vector.broadcast %192 : vector<2x1xf32> to vector<2x32xf32>
    %194 = arith.mulf %193, %156 : vector<2x32xf32>
    %195 = arith.addf %190, %194 : vector<2x32xf32>
    %c1_72 = arith.constant 1 : index
    %c0_73 = arith.constant 0 : index
    %c0_74 = arith.constant 0 : index
    %196 = vector.load %arg10[%c1_72, %c0_73, %c0_74] : memref<2x2x32xf32, #tpu.memory_space<vmem>>, vector<1x2x32xf32>
    %197 = vector.shape_cast %196 : vector<1x2x32xf32> to vector<2x32xf32>
    %198 = vector.shape_cast %195 : vector<2x32xf32> to vector<1x2x32xf32>
    tpu.vector_store %arg10[%c1_72, %c0_73, %c0_74], %198 {strides = array<i32>} : memref<2x2x32xf32, #tpu.memory_space<vmem>>, vector<1x2x32xf32>,
    %cst_75 = arith.constant 2.000000e+00 : f32
    %199 = vector.broadcast %cst_75 : f32 to vector<2x1xf32>
    %200 = arith.cmpf ogt, %0, %199 : vector<2x1xf32>
    %201 = arith.extui %200 : vector<2x1xi1> to vector<2x1xi32>
    %202 = arith.sitofp %201 : vector<2x1xi32> to vector<2x1xf32>
    %c2 = arith.constant 2 : index
    %c0_76 = arith.constant 0 : index
    %c0_77 = arith.constant 0 : index
    %203 = vector.load %arg0[%c2, %c0_76, %c0_77] : memref<5x2x36xf32, #tpu.memory_space<vmem>>, vector<1x2x36xf32>
    %204 = vector.shape_cast %203 : vector<1x2x36xf32> to vector<2x36xf32>
    %c0_78 = arith.constant 0 : index
    %c0_79 = arith.constant 0 : index
    %c0_80 = arith.constant 0 : index
    %205 = vector.load %arg10[%c0_78, %c0_79, %c0_80] : memref<2x2x32xf32, #tpu.memory_space<vmem>>, vector<1x2x32xf32>
    %206 = vector.shape_cast %205 : vector<1x2x32xf32> to vector<2x32xf32>
    %cst_81 = arith.constant dense<0.000000e+00> : vector<2x96xf32>
    %207 = tpu.matmul %204, %1, %cst_81 {dimension_numbers = #tpu.dot_dimension_numbers<[1], [0], [0], [1], [0, 0, 1, 1], [], []>} : vector<2x36xf32>, vector<36x96xf32>, vector<2x96xf32> -> vector<2x96xf32>
    %208 = vector.broadcast %3 : vector<1x96xf32> to vector<2x96xf32>
    %209 = arith.addf %207, %208 : vector<2x96xf32>
    %cst_82 = arith.constant dense<0.000000e+00> : vector<2x96xf32>
    %210 = tpu.matmul %206, %2, %cst_82 {dimension_numbers = #tpu.dot_dimension_numbers<[1], [0], [0], [1], [0, 0, 1, 1], [], []>} : vector<2x32xf32>, vector<32x96xf32>, vector<2x96xf32> -> vector<2x96xf32>
    %211 = vector.broadcast %4 : vector<1x96xf32> to vector<2x96xf32>
    %212 = arith.addf %210, %211 : vector<2x96xf32>
    %213 = vector.extract_strided_slice %209 {offsets = [0, 0], sizes = [2, 32], strides = [1, 1]} : vector<2x96xf32> to vector<2x32xf32>
    %214 = vector.extract_strided_slice %212 {offsets = [0, 0], sizes = [2, 32], strides = [1, 1]} : vector<2x96xf32> to vector<2x32xf32>
    %215 = arith.addf %213, %214 : vector<2x32xf32>
    %216 = arith.negf %215 : vector<2x32xf32>
    %217 = math.exp %216 : vector<2x32xf32>
    %cst_83 = arith.constant 1.000000e+00 : f32
    %218 = vector.broadcast %cst_83 : f32 to vector<2x32xf32>
    %219 = arith.addf %218, %217 : vector<2x32xf32>
    %220 = arith.divf %218, %219 : vector<2x32xf32>
    %221 = vector.extract_strided_slice %209 {offsets = [0, 32], sizes = [2, 32], strides = [1, 1]} : vector<2x96xf32> to vector<2x32xf32>
    %222 = vector.extract_strided_slice %212 {offsets = [0, 32], sizes = [2, 32], strides = [1, 1]} : vector<2x96xf32> to vector<2x32xf32>
    %223 = arith.addf %221, %222 : vector<2x32xf32>
    %224 = arith.negf %223 : vector<2x32xf32>
    %225 = math.exp %224 : vector<2x32xf32>
    %cst_84 = arith.constant 1.000000e+00 : f32
    %226 = vector.broadcast %cst_84 : f32 to vector<2x32xf32>
    %227 = arith.addf %226, %225 : vector<2x32xf32>
    %228 = arith.divf %226, %227 : vector<2x32xf32>
    %229 = vector.extract_strided_slice %209 {offsets = [0, 64], sizes = [2, 32], strides = [1, 1]} : vector<2x96xf32> to vector<2x32xf32>
    %230 = vector.extract_strided_slice %212 {offsets = [0, 64], sizes = [2, 32], strides = [1, 1]} : vector<2x96xf32> to vector<2x32xf32>
    %231 = arith.mulf %220, %230 : vector<2x32xf32>
    %232 = arith.addf %229, %231 : vector<2x32xf32>
    %233 = math.tanh %232 : vector<2x32xf32>
    %cst_85 = arith.constant 1.000000e+00 : f32
    %234 = vector.broadcast %cst_85 : f32 to vector<2x32xf32>
    %235 = arith.subf %234, %228 : vector<2x32xf32>
    %236 = arith.mulf %235, %233 : vector<2x32xf32>
    %237 = arith.mulf %228, %206 : vector<2x32xf32>
    %238 = arith.addf %236, %237 : vector<2x32xf32>
    %239 = vector.broadcast %202 : vector<2x1xf32> to vector<2x32xf32>
    %240 = arith.mulf %239, %238 : vector<2x32xf32>
    %cst_86 = arith.constant 1.000000e+00 : f32
    %241 = vector.broadcast %cst_86 : f32 to vector<2x1xf32>
    %242 = arith.subf %241, %202 : vector<2x1xf32>
    %243 = vector.broadcast %242 : vector<2x1xf32> to vector<2x32xf32>
    %244 = arith.mulf %243, %206 : vector<2x32xf32>
    %245 = arith.addf %240, %244 : vector<2x32xf32>
    %c0_87 = arith.constant 0 : index
    %c0_88 = arith.constant 0 : index
    %c0_89 = arith.constant 0 : index
    %246 = vector.load %arg10[%c0_87, %c0_88, %c0_89] : memref<2x2x32xf32, #tpu.memory_space<vmem>>, vector<1x2x32xf32>
    %247 = vector.shape_cast %246 : vector<1x2x32xf32> to vector<2x32xf32>
    %248 = vector.shape_cast %245 : vector<2x32xf32> to vector<1x2x32xf32>
    tpu.vector_store %arg10[%c0_87, %c0_88, %c0_89], %248 {strides = array<i32>} : memref<2x2x32xf32, #tpu.memory_space<vmem>>, vector<1x2x32xf32>,
    %c1_90 = arith.constant 1 : index
    %c0_91 = arith.constant 0 : index
    %c0_92 = arith.constant 0 : index
    %249 = vector.load %arg10[%c1_90, %c0_91, %c0_92] : memref<2x2x32xf32, #tpu.memory_space<vmem>>, vector<1x2x32xf32>
    %250 = vector.shape_cast %249 : vector<1x2x32xf32> to vector<2x32xf32>
    %cst_93 = arith.constant dense<0.000000e+00> : vector<2x96xf32>
    %251 = tpu.matmul %245, %5, %cst_93 {dimension_numbers = #tpu.dot_dimension_numbers<[1], [0], [0], [1], [0, 0, 1, 1], [], []>} : vector<2x32xf32>, vector<32x96xf32>, vector<2x96xf32> -> vector<2x96xf32>
    %252 = vector.broadcast %7 : vector<1x96xf32> to vector<2x96xf32>
    %253 = arith.addf %251, %252 : vector<2x96xf32>
    %cst_94 = arith.constant dense<0.000000e+00> : vector<2x96xf32>
    %254 = tpu.matmul %250, %6, %cst_94 {dimension_numbers = #tpu.dot_dimension_numbers<[1], [0], [0], [1], [0, 0, 1, 1], [], []>} : vector<2x32xf32>, vector<32x96xf32>, vector<2x96xf32> -> vector<2x96xf32>
    %255 = vector.broadcast %8 : vector<1x96xf32> to vector<2x96xf32>
    %256 = arith.addf %254, %255 : vector<2x96xf32>
    %257 = vector.extract_strided_slice %253 {offsets = [0, 0], sizes = [2, 32], strides = [1, 1]} : vector<2x96xf32> to vector<2x32xf32>
    %258 = vector.extract_strided_slice %256 {offsets = [0, 0], sizes = [2, 32], strides = [1, 1]} : vector<2x96xf32> to vector<2x32xf32>
    %259 = arith.addf %257, %258 : vector<2x32xf32>
    %260 = arith.negf %259 : vector<2x32xf32>
    %261 = math.exp %260 : vector<2x32xf32>
    %cst_95 = arith.constant 1.000000e+00 : f32
    %262 = vector.broadcast %cst_95 : f32 to vector<2x32xf32>
    %263 = arith.addf %262, %261 : vector<2x32xf32>
    %264 = arith.divf %262, %263 : vector<2x32xf32>
    %265 = vector.extract_strided_slice %253 {offsets = [0, 32], sizes = [2, 32], strides = [1, 1]} : vector<2x96xf32> to vector<2x32xf32>
    %266 = vector.extract_strided_slice %256 {offsets = [0, 32], sizes = [2, 32], strides = [1, 1]} : vector<2x96xf32> to vector<2x32xf32>
    %267 = arith.addf %265, %266 : vector<2x32xf32>
    %268 = arith.negf %267 : vector<2x32xf32>
    %269 = math.exp %268 : vector<2x32xf32>
    %cst_96 = arith.constant 1.000000e+00 : f32
    %270 = vector.broadcast %cst_96 : f32 to vector<2x32xf32>
    %271 = arith.addf %270, %269 : vector<2x32xf32>
    %272 = arith.divf %270, %271 : vector<2x32xf32>
    %273 = vector.extract_strided_slice %253 {offsets = [0, 64], sizes = [2, 32], strides = [1, 1]} : vector<2x96xf32> to vector<2x32xf32>
    %274 = vector.extract_strided_slice %256 {offsets = [0, 64], sizes = [2, 32], strides = [1, 1]} : vector<2x96xf32> to vector<2x32xf32>
    %275 = arith.mulf %264, %274 : vector<2x32xf32>
    %276 = arith.addf %273, %275 : vector<2x32xf32>
    %277 = math.tanh %276 : vector<2x32xf32>
    %cst_97 = arith.constant 1.000000e+00 : f32
    %278 = vector.broadcast %cst_97 : f32 to vector<2x32xf32>
    %279 = arith.subf %278, %272 : vector<2x32xf32>
    %280 = arith.mulf %279, %277 : vector<2x32xf32>
    %281 = arith.mulf %272, %250 : vector<2x32xf32>
    %282 = arith.addf %280, %281 : vector<2x32xf32>
    %283 = vector.broadcast %202 : vector<2x1xf32> to vector<2x32xf32>
    %284 = arith.mulf %283, %282 : vector<2x32xf32>
    %cst_98 = arith.constant 1.000000e+00 : f32
    %285 = vector.broadcast %cst_98 : f32 to vector<2x1xf32>
    %286 = arith.subf %285, %202 : vector<2x1xf32>
    %287 = vector.broadcast %286 : vector<2x1xf32> to vector<2x32xf32>
    %288 = arith.mulf %287, %250 : vector<2x32xf32>
    %289 = arith.addf %284, %288 : vector<2x32xf32>
    %c1_99 = arith.constant 1 : index
    %c0_100 = arith.constant 0 : index
    %c0_101 = arith.constant 0 : index
    %290 = vector.load %arg10[%c1_99, %c0_100, %c0_101] : memref<2x2x32xf32, #tpu.memory_space<vmem>>, vector<1x2x32xf32>
    %291 = vector.shape_cast %290 : vector<1x2x32xf32> to vector<2x32xf32>
    %292 = vector.shape_cast %289 : vector<2x32xf32> to vector<1x2x32xf32>
    tpu.vector_store %arg10[%c1_99, %c0_100, %c0_101], %292 {strides = array<i32>} : memref<2x2x32xf32, #tpu.memory_space<vmem>>, vector<1x2x32xf32>,
    %cst_102 = arith.constant 3.000000e+00 : f32
    %293 = vector.broadcast %cst_102 : f32 to vector<2x1xf32>
    %294 = arith.cmpf ogt, %0, %293 : vector<2x1xf32>
    %295 = arith.extui %294 : vector<2x1xi1> to vector<2x1xi32>
    %296 = arith.sitofp %295 : vector<2x1xi32> to vector<2x1xf32>
    %c3 = arith.constant 3 : index
    %c0_103 = arith.constant 0 : index
    %c0_104 = arith.constant 0 : index
    %297 = vector.load %arg0[%c3, %c0_103, %c0_104] : memref<5x2x36xf32, #tpu.memory_space<vmem>>, vector<1x2x36xf32>
    %298 = vector.shape_cast %297 : vector<1x2x36xf32> to vector<2x36xf32>
    %c0_105 = arith.constant 0 : index
    %c0_106 = arith.constant 0 : index
    %c0_107 = arith.constant 0 : index
    %299 = vector.load %arg10[%c0_105, %c0_106, %c0_107] : memref<2x2x32xf32, #tpu.memory_space<vmem>>, vector<1x2x32xf32>
    %300 = vector.shape_cast %299 : vector<1x2x32xf32> to vector<2x32xf32>
    %cst_108 = arith.constant dense<0.000000e+00> : vector<2x96xf32>
    %301 = tpu.matmul %298, %1, %cst_108 {dimension_numbers = #tpu.dot_dimension_numbers<[1], [0], [0], [1], [0, 0, 1, 1], [], []>} : vector<2x36xf32>, vector<36x96xf32>, vector<2x96xf32> -> vector<2x96xf32>
    %302 = vector.broadcast %3 : vector<1x96xf32> to vector<2x96xf32>
    %303 = arith.addf %301, %302 : vector<2x96xf32>
    %cst_109 = arith.constant dense<0.000000e+00> : vector<2x96xf32>
    %304 = tpu.matmul %300, %2, %cst_109 {dimension_numbers = #tpu.dot_dimension_numbers<[1], [0], [0], [1], [0, 0, 1, 1], [], []>} : vector<2x32xf32>, vector<32x96xf32>, vector<2x96xf32> -> vector<2x96xf32>
    %305 = vector.broadcast %4 : vector<1x96xf32> to vector<2x96xf32>
    %306 = arith.addf %304, %305 : vector<2x96xf32>
    %307 = vector.extract_strided_slice %303 {offsets = [0, 0], sizes = [2, 32], strides = [1, 1]} : vector<2x96xf32> to vector<2x32xf32>
    %308 = vector.extract_strided_slice %306 {offsets = [0, 0], sizes = [2, 32], strides = [1, 1]} : vector<2x96xf32> to vector<2x32xf32>
    %309 = arith.addf %307, %308 : vector<2x32xf32>
    %310 = arith.negf %309 : vector<2x32xf32>
    %311 = math.exp %310 : vector<2x32xf32>
    %cst_110 = arith.constant 1.000000e+00 : f32
    %312 = vector.broadcast %cst_110 : f32 to vector<2x32xf32>
    %313 = arith.addf %312, %311 : vector<2x32xf32>
    %314 = arith.divf %312, %313 : vector<2x32xf32>
    %315 = vector.extract_strided_slice %303 {offsets = [0, 32], sizes = [2, 32], strides = [1, 1]} : vector<2x96xf32> to vector<2x32xf32>
    %316 = vector.extract_strided_slice %306 {offsets = [0, 32], sizes = [2, 32], strides = [1, 1]} : vector<2x96xf32> to vector<2x32xf32>
    %317 = arith.addf %315, %316 : vector<2x32xf32>
    %318 = arith.negf %317 : vector<2x32xf32>
    %319 = math.exp %318 : vector<2x32xf32>
    %cst_111 = arith.constant 1.000000e+00 : f32
    %320 = vector.broadcast %cst_111 : f32 to vector<2x32xf32>
    %321 = arith.addf %320, %319 : vector<2x32xf32>
    %322 = arith.divf %320, %321 : vector<2x32xf32>
    %323 = vector.extract_strided_slice %303 {offsets = [0, 64], sizes = [2, 32], strides = [1, 1]} : vector<2x96xf32> to vector<2x32xf32>
    %324 = vector.extract_strided_slice %306 {offsets = [0, 64], sizes = [2, 32], strides = [1, 1]} : vector<2x96xf32> to vector<2x32xf32>
    %325 = arith.mulf %314, %324 : vector<2x32xf32>
    %326 = arith.addf %323, %325 : vector<2x32xf32>
    %327 = math.tanh %326 : vector<2x32xf32>
    %cst_112 = arith.constant 1.000000e+00 : f32
    %328 = vector.broadcast %cst_112 : f32 to vector<2x32xf32>
    %329 = arith.subf %328, %322 : vector<2x32xf32>
    %330 = arith.mulf %329, %327 : vector<2x32xf32>
    %331 = arith.mulf %322, %300 : vector<2x32xf32>
    %332 = arith.addf %330, %331 : vector<2x32xf32>
    %333 = vector.broadcast %296 : vector<2x1xf32> to vector<2x32xf32>
    %334 = arith.mulf %333, %332 : vector<2x32xf32>
    %cst_113 = arith.constant 1.000000e+00 : f32
    %335 = vector.broadcast %cst_113 : f32 to vector<2x1xf32>
    %336 = arith.subf %335, %296 : vector<2x1xf32>
    %337 = vector.broadcast %336 : vector<2x1xf32> to vector<2x32xf32>
    %338 = arith.mulf %337, %300 : vector<2x32xf32>
    %339 = arith.addf %334, %338 : vector<2x32xf32>
    %c0_114 = arith.constant 0 : index
    %c0_115 = arith.constant 0 : index
    %c0_116 = arith.constant 0 : index
    %340 = vector.load %arg10[%c0_114, %c0_115, %c0_116] : memref<2x2x32xf32, #tpu.memory_space<vmem>>, vector<1x2x32xf32>
    %341 = vector.shape_cast %340 : vector<1x2x32xf32> to vector<2x32xf32>
    %342 = vector.shape_cast %339 : vector<2x32xf32> to vector<1x2x32xf32>
    tpu.vector_store %arg10[%c0_114, %c0_115, %c0_116], %342 {strides = array<i32>} : memref<2x2x32xf32, #tpu.memory_space<vmem>>, vector<1x2x32xf32>,
    %c1_117 = arith.constant 1 : index
    %c0_118 = arith.constant 0 : index
    %c0_119 = arith.constant 0 : index
    %343 = vector.load %arg10[%c1_117, %c0_118, %c0_119] : memref<2x2x32xf32, #tpu.memory_space<vmem>>, vector<1x2x32xf32>
    %344 = vector.shape_cast %343 : vector<1x2x32xf32> to vector<2x32xf32>
    %cst_120 = arith.constant dense<0.000000e+00> : vector<2x96xf32>
    %345 = tpu.matmul %339, %5, %cst_120 {dimension_numbers = #tpu.dot_dimension_numbers<[1], [0], [0], [1], [0, 0, 1, 1], [], []>} : vector<2x32xf32>, vector<32x96xf32>, vector<2x96xf32> -> vector<2x96xf32>
    %346 = vector.broadcast %7 : vector<1x96xf32> to vector<2x96xf32>
    %347 = arith.addf %345, %346 : vector<2x96xf32>
    %cst_121 = arith.constant dense<0.000000e+00> : vector<2x96xf32>
    %348 = tpu.matmul %344, %6, %cst_121 {dimension_numbers = #tpu.dot_dimension_numbers<[1], [0], [0], [1], [0, 0, 1, 1], [], []>} : vector<2x32xf32>, vector<32x96xf32>, vector<2x96xf32> -> vector<2x96xf32>
    %349 = vector.broadcast %8 : vector<1x96xf32> to vector<2x96xf32>
    %350 = arith.addf %348, %349 : vector<2x96xf32>
    %351 = vector.extract_strided_slice %347 {offsets = [0, 0], sizes = [2, 32], strides = [1, 1]} : vector<2x96xf32> to vector<2x32xf32>
    %352 = vector.extract_strided_slice %350 {offsets = [0, 0], sizes = [2, 32], strides = [1, 1]} : vector<2x96xf32> to vector<2x32xf32>
    %353 = arith.addf %351, %352 : vector<2x32xf32>
    %354 = arith.negf %353 : vector<2x32xf32>
    %355 = math.exp %354 : vector<2x32xf32>
    %cst_122 = arith.constant 1.000000e+00 : f32
    %356 = vector.broadcast %cst_122 : f32 to vector<2x32xf32>
    %357 = arith.addf %356, %355 : vector<2x32xf32>
    %358 = arith.divf %356, %357 : vector<2x32xf32>
    %359 = vector.extract_strided_slice %347 {offsets = [0, 32], sizes = [2, 32], strides = [1, 1]} : vector<2x96xf32> to vector<2x32xf32>
    %360 = vector.extract_strided_slice %350 {offsets = [0, 32], sizes = [2, 32], strides = [1, 1]} : vector<2x96xf32> to vector<2x32xf32>
    %361 = arith.addf %359, %360 : vector<2x32xf32>
    %362 = arith.negf %361 : vector<2x32xf32>
    %363 = math.exp %362 : vector<2x32xf32>
    %cst_123 = arith.constant 1.000000e+00 : f32
    %364 = vector.broadcast %cst_123 : f32 to vector<2x32xf32>
    %365 = arith.addf %364, %363 : vector<2x32xf32>
    %366 = arith.divf %364, %365 : vector<2x32xf32>
    %367 = vector.extract_strided_slice %347 {offsets = [0, 64], sizes = [2, 32], strides = [1, 1]} : vector<2x96xf32> to vector<2x32xf32>
    %368 = vector.extract_strided_slice %350 {offsets = [0, 64], sizes = [2, 32], strides = [1, 1]} : vector<2x96xf32> to vector<2x32xf32>
    %369 = arith.mulf %358, %368 : vector<2x32xf32>
    %370 = arith.addf %367, %369 : vector<2x32xf32>
    %371 = math.tanh %370 : vector<2x32xf32>
    %cst_124 = arith.constant 1.000000e+00 : f32
    %372 = vector.broadcast %cst_124 : f32 to vector<2x32xf32>
    %373 = arith.subf %372, %366 : vector<2x32xf32>
    %374 = arith.mulf %373, %371 : vector<2x32xf32>
    %375 = arith.mulf %366, %344 : vector<2x32xf32>
    %376 = arith.addf %374, %375 : vector<2x32xf32>
    %377 = vector.broadcast %296 : vector<2x1xf32> to vector<2x32xf32>
    %378 = arith.mulf %377, %376 : vector<2x32xf32>
    %cst_125 = arith.constant 1.000000e+00 : f32
    %379 = vector.broadcast %cst_125 : f32 to vector<2x1xf32>
    %380 = arith.subf %379, %296 : vector<2x1xf32>
    %381 = vector.broadcast %380 : vector<2x1xf32> to vector<2x32xf32>
    %382 = arith.mulf %381, %344 : vector<2x32xf32>
    %383 = arith.addf %378, %382 : vector<2x32xf32>
    %c1_126 = arith.constant 1 : index
    %c0_127 = arith.constant 0 : index
    %c0_128 = arith.constant 0 : index
    %384 = vector.load %arg10[%c1_126, %c0_127, %c0_128] : memref<2x2x32xf32, #tpu.memory_space<vmem>>, vector<1x2x32xf32>
    %385 = vector.shape_cast %384 : vector<1x2x32xf32> to vector<2x32xf32>
    %386 = vector.shape_cast %383 : vector<2x32xf32> to vector<1x2x32xf32>
    tpu.vector_store %arg10[%c1_126, %c0_127, %c0_128], %386 {strides = array<i32>} : memref<2x2x32xf32, #tpu.memory_space<vmem>>, vector<1x2x32xf32>,
    %cst_129 = arith.constant 4.000000e+00 : f32
    %387 = vector.broadcast %cst_129 : f32 to vector<2x1xf32>
    %388 = arith.cmpf ogt, %0, %387 : vector<2x1xf32>
    %389 = arith.extui %388 : vector<2x1xi1> to vector<2x1xi32>
    %390 = arith.sitofp %389 : vector<2x1xi32> to vector<2x1xf32>
    %c4 = arith.constant 4 : index
    %c0_130 = arith.constant 0 : index
    %c0_131 = arith.constant 0 : index
    %391 = vector.load %arg0[%c4, %c0_130, %c0_131] : memref<5x2x36xf32, #tpu.memory_space<vmem>>, vector<1x2x36xf32>
    %392 = vector.shape_cast %391 : vector<1x2x36xf32> to vector<2x36xf32>
    %c0_132 = arith.constant 0 : index
    %c0_133 = arith.constant 0 : index
    %c0_134 = arith.constant 0 : index
    %393 = vector.load %arg10[%c0_132, %c0_133, %c0_134] : memref<2x2x32xf32, #tpu.memory_space<vmem>>, vector<1x2x32xf32>
    %394 = vector.shape_cast %393 : vector<1x2x32xf32> to vector<2x32xf32>
    %cst_135 = arith.constant dense<0.000000e+00> : vector<2x96xf32>
    %395 = tpu.matmul %392, %1, %cst_135 {dimension_numbers = #tpu.dot_dimension_numbers<[1], [0], [0], [1], [0, 0, 1, 1], [], []>} : vector<2x36xf32>, vector<36x96xf32>, vector<2x96xf32> -> vector<2x96xf32>
    %396 = vector.broadcast %3 : vector<1x96xf32> to vector<2x96xf32>
    %397 = arith.addf %395, %396 : vector<2x96xf32>
    %cst_136 = arith.constant dense<0.000000e+00> : vector<2x96xf32>
    %398 = tpu.matmul %394, %2, %cst_136 {dimension_numbers = #tpu.dot_dimension_numbers<[1], [0], [0], [1], [0, 0, 1, 1], [], []>} : vector<2x32xf32>, vector<32x96xf32>, vector<2x96xf32> -> vector<2x96xf32>
    %399 = vector.broadcast %4 : vector<1x96xf32> to vector<2x96xf32>
    %400 = arith.addf %398, %399 : vector<2x96xf32>
    %401 = vector.extract_strided_slice %397 {offsets = [0, 0], sizes = [2, 32], strides = [1, 1]} : vector<2x96xf32> to vector<2x32xf32>
    %402 = vector.extract_strided_slice %400 {offsets = [0, 0], sizes = [2, 32], strides = [1, 1]} : vector<2x96xf32> to vector<2x32xf32>
    %403 = arith.addf %401, %402 : vector<2x32xf32>
    %404 = arith.negf %403 : vector<2x32xf32>
    %405 = math.exp %404 : vector<2x32xf32>
    %cst_137 = arith.constant 1.000000e+00 : f32
    %406 = vector.broadcast %cst_137 : f32 to vector<2x32xf32>
    %407 = arith.addf %406, %405 : vector<2x32xf32>
    %408 = arith.divf %406, %407 : vector<2x32xf32>
    %409 = vector.extract_strided_slice %397 {offsets = [0, 32], sizes = [2, 32], strides = [1, 1]} : vector<2x96xf32> to vector<2x32xf32>
    %410 = vector.extract_strided_slice %400 {offsets = [0, 32], sizes = [2, 32], strides = [1, 1]} : vector<2x96xf32> to vector<2x32xf32>
    %411 = arith.addf %409, %410 : vector<2x32xf32>
    %412 = arith.negf %411 : vector<2x32xf32>
    %413 = math.exp %412 : vector<2x32xf32>
    %cst_138 = arith.constant 1.000000e+00 : f32
    %414 = vector.broadcast %cst_138 : f32 to vector<2x32xf32>
    %415 = arith.addf %414, %413 : vector<2x32xf32>
    %416 = arith.divf %414, %415 : vector<2x32xf32>
    %417 = vector.extract_strided_slice %397 {offsets = [0, 64], sizes = [2, 32], strides = [1, 1]} : vector<2x96xf32> to vector<2x32xf32>
    %418 = vector.extract_strided_slice %400 {offsets = [0, 64], sizes = [2, 32], strides = [1, 1]} : vector<2x96xf32> to vector<2x32xf32>
    %419 = arith.mulf %408, %418 : vector<2x32xf32>
    %420 = arith.addf %417, %419 : vector<2x32xf32>
    %421 = math.tanh %420 : vector<2x32xf32>
    %cst_139 = arith.constant 1.000000e+00 : f32
    %422 = vector.broadcast %cst_139 : f32 to vector<2x32xf32>
    %423 = arith.subf %422, %416 : vector<2x32xf32>
    %424 = arith.mulf %423, %421 : vector<2x32xf32>
    %425 = arith.mulf %416, %394 : vector<2x32xf32>
    %426 = arith.addf %424, %425 : vector<2x32xf32>
    %427 = vector.broadcast %390 : vector<2x1xf32> to vector<2x32xf32>
    %428 = arith.mulf %427, %426 : vector<2x32xf32>
    %cst_140 = arith.constant 1.000000e+00 : f32
    %429 = vector.broadcast %cst_140 : f32 to vector<2x1xf32>
    %430 = arith.subf %429, %390 : vector<2x1xf32>
    %431 = vector.broadcast %430 : vector<2x1xf32> to vector<2x32xf32>
    %432 = arith.mulf %431, %394 : vector<2x32xf32>
    %433 = arith.addf %428, %432 : vector<2x32xf32>
    %c0_141 = arith.constant 0 : index
    %c0_142 = arith.constant 0 : index
    %c0_143 = arith.constant 0 : index
    %434 = vector.load %arg10[%c0_141, %c0_142, %c0_143] : memref<2x2x32xf32, #tpu.memory_space<vmem>>, vector<1x2x32xf32>
    %435 = vector.shape_cast %434 : vector<1x2x32xf32> to vector<2x32xf32>
    %436 = vector.shape_cast %433 : vector<2x32xf32> to vector<1x2x32xf32>
    tpu.vector_store %arg10[%c0_141, %c0_142, %c0_143], %436 {strides = array<i32>} : memref<2x2x32xf32, #tpu.memory_space<vmem>>, vector<1x2x32xf32>,
    %c1_144 = arith.constant 1 : index
    %c0_145 = arith.constant 0 : index
    %c0_146 = arith.constant 0 : index
    %437 = vector.load %arg10[%c1_144, %c0_145, %c0_146] : memref<2x2x32xf32, #tpu.memory_space<vmem>>, vector<1x2x32xf32>
    %438 = vector.shape_cast %437 : vector<1x2x32xf32> to vector<2x32xf32>
    %cst_147 = arith.constant dense<0.000000e+00> : vector<2x96xf32>
    %439 = tpu.matmul %433, %5, %cst_147 {dimension_numbers = #tpu.dot_dimension_numbers<[1], [0], [0], [1], [0, 0, 1, 1], [], []>} : vector<2x32xf32>, vector<32x96xf32>, vector<2x96xf32> -> vector<2x96xf32>
    %440 = vector.broadcast %7 : vector<1x96xf32> to vector<2x96xf32>
    %441 = arith.addf %439, %440 : vector<2x96xf32>
    %cst_148 = arith.constant dense<0.000000e+00> : vector<2x96xf32>
    %442 = tpu.matmul %438, %6, %cst_148 {dimension_numbers = #tpu.dot_dimension_numbers<[1], [0], [0], [1], [0, 0, 1, 1], [], []>} : vector<2x32xf32>, vector<32x96xf32>, vector<2x96xf32> -> vector<2x96xf32>
    %443 = vector.broadcast %8 : vector<1x96xf32> to vector<2x96xf32>
    %444 = arith.addf %442, %443 : vector<2x96xf32>
    %445 = vector.extract_strided_slice %441 {offsets = [0, 0], sizes = [2, 32], strides = [1, 1]} : vector<2x96xf32> to vector<2x32xf32>
    %446 = vector.extract_strided_slice %444 {offsets = [0, 0], sizes = [2, 32], strides = [1, 1]} : vector<2x96xf32> to vector<2x32xf32>
    %447 = arith.addf %445, %446 : vector<2x32xf32>
    %448 = arith.negf %447 : vector<2x32xf32>
    %449 = math.exp %448 : vector<2x32xf32>
    %cst_149 = arith.constant 1.000000e+00 : f32
    %450 = vector.broadcast %cst_149 : f32 to vector<2x32xf32>
    %451 = arith.addf %450, %449 : vector<2x32xf32>
    %452 = arith.divf %450, %451 : vector<2x32xf32>
    %453 = vector.extract_strided_slice %441 {offsets = [0, 32], sizes = [2, 32], strides = [1, 1]} : vector<2x96xf32> to vector<2x32xf32>
    %454 = vector.extract_strided_slice %444 {offsets = [0, 32], sizes = [2, 32], strides = [1, 1]} : vector<2x96xf32> to vector<2x32xf32>
    %455 = arith.addf %453, %454 : vector<2x32xf32>
    %456 = arith.negf %455 : vector<2x32xf32>
    %457 = math.exp %456 : vector<2x32xf32>
    %cst_150 = arith.constant 1.000000e+00 : f32
    %458 = vector.broadcast %cst_150 : f32 to vector<2x32xf32>
    %459 = arith.addf %458, %457 : vector<2x32xf32>
    %460 = arith.divf %458, %459 : vector<2x32xf32>
    %461 = vector.extract_strided_slice %441 {offsets = [0, 64], sizes = [2, 32], strides = [1, 1]} : vector<2x96xf32> to vector<2x32xf32>
    %462 = vector.extract_strided_slice %444 {offsets = [0, 64], sizes = [2, 32], strides = [1, 1]} : vector<2x96xf32> to vector<2x32xf32>
    %463 = arith.mulf %452, %462 : vector<2x32xf32>
    %464 = arith.addf %461, %463 : vector<2x32xf32>
    %465 = math.tanh %464 : vector<2x32xf32>
    %cst_151 = arith.constant 1.000000e+00 : f32
    %466 = vector.broadcast %cst_151 : f32 to vector<2x32xf32>
    %467 = arith.subf %466, %460 : vector<2x32xf32>
    %468 = arith.mulf %467, %465 : vector<2x32xf32>
    %469 = arith.mulf %460, %438 : vector<2x32xf32>
    %470 = arith.addf %468, %469 : vector<2x32xf32>
    %471 = vector.broadcast %390 : vector<2x1xf32> to vector<2x32xf32>
    %472 = arith.mulf %471, %470 : vector<2x32xf32>
    %cst_152 = arith.constant 1.000000e+00 : f32
    %473 = vector.broadcast %cst_152 : f32 to vector<2x1xf32>
    %474 = arith.subf %473, %390 : vector<2x1xf32>
    %475 = vector.broadcast %474 : vector<2x1xf32> to vector<2x32xf32>
    %476 = arith.mulf %475, %438 : vector<2x32xf32>
    %477 = arith.addf %472, %476 : vector<2x32xf32>
    %c1_153 = arith.constant 1 : index
    %c0_154 = arith.constant 0 : index
    %c0_155 = arith.constant 0 : index
    %478 = vector.load %arg10[%c1_153, %c0_154, %c0_155] : memref<2x2x32xf32, #tpu.memory_space<vmem>>, vector<1x2x32xf32>
    %479 = vector.shape_cast %478 : vector<1x2x32xf32> to vector<2x32xf32>
    %480 = vector.shape_cast %477 : vector<2x32xf32> to vector<1x2x32xf32>
    tpu.vector_store %arg10[%c1_153, %c0_154, %c0_155], %480 {strides = array<i32>} : memref<2x2x32xf32, #tpu.memory_space<vmem>>, vector<1x2x32xf32>,
    return
  }
}

</mosaic_0001>

<bundles_post_ra>
// kernel: tpu_custom_call.1
= control target key start
LH: loop header
LB: loop body
LE: loop exit
PB: predicated region body
PF: predicated region fallthrough
CT: control target
= control target key end

     0   :  { %15 = vsyncpa [#allocation3], 0  ;;  %s1978_s0 = inlined_call_operand.hbm [shape: f32[5,2,36], index: 0, kind: input, shape index: {}]   ;;  %s1979_s1 = inlined_call_operand.vmem [shape: f32[2,1], index: 1, kind: input, shape index: {}]   ;;  %s1980_s2 = inlined_call_operand.hbm [shape: f32[36,96], index: 2, kind: input, shape index: {}]   ;;  %s1981_s3 = inlined_call_operand.hbm [shape: f32[32,96], index: 3, kind: input, shape index: {}]   ;;  %s1982_s4 = inlined_call_operand.vmem [shape: f32[1,96], index: 4, kind: input, shape index: {}]   ;;  %s1983_s5 = inlined_call_operand.vmem [shape: f32[1,96], index: 5, kind: input, shape index: {}]   ;;  %s1984_s6 = inlined_call_operand.hbm [shape: f32[32,96], index: 6, kind: input, shape index: {}]   ;;  %s1985_s7 = inlined_call_operand.hbm [shape: f32[32,96], index: 7, kind: input, shape index: {}]   ;;  %s1986_s8 = inlined_call_operand.vmem [shape: f32[1,96], index: 8, kind: input, shape index: {}]   ;;  %s1987_s9 = inlined_call_operand.vmem [shape: f32[1,96], index: 9, kind: input, shape index: {}]   ;;  %s1988_s10 = inlined_call_operand.hbm [shape: f32[2,2,32], index: 10, kind: output, shape index: {}]  }
   0x1   :  { %16 = vsyncpa [#allocation6], 0 }
   0x2   :  { %17 = vsyncpa [#allocation9], 0  ;;  %s38_s15 = sshll.u32 %s1980_s2, 4  ;;  %s39_s15 = int_to_ptr.hbm [resolvable:$true] %s38_s15 }
   0x3   :  { %18 = vsyncpa [#allocation4], 0  ;;  %s1536_s16 = smov [#allocation5]   ;;  %s68_s20 = sshll.u32 %s1984_s6, 4  ;;  %s69_s20 = int_to_ptr.hbm [resolvable:$true] %s68_s20 }
   0x4   :  { %s40_s17 = sshll.u32 %s1536_s16, 4  ;;  %s1537_s21 = smov 128   ;;  %s41_s17 = int_to_ptr.vmem [resolvable:$true] %s40_s17 }
   0x5   :  { %s1538_s22 = smov 8   ;;  %s1539_s23 = smov [#allocation8]  }
   0x6   :  { %46 = dma.hbm_to_vmem [thread:$0]  %s39_s15, 640, %s41_s17, [#allocation6], %s1537_s21, %s1537_s21, %s1538_s22  }
   0x7   :  { %s70_s24 = sshll.u32 %s1539_s23, 4  ;;  %s23_s26 = sshll.u32 %s1978_s0, 4  ;;  %s71_s24 = int_to_ptr.vmem [resolvable:$true] %s70_s24  ;;  %s24_s26 = int_to_ptr.hbm [resolvable:$true] %s23_s26 }
   0x8   :  { %76 = dma.hbm_to_vmem [thread:$0]  %s69_s20, 512, %s71_s24, [#allocation9], %s1537_s21, %s1537_s21, %s1538_s22  }
   0x9   :  { %s1540_s6 = smov [#allocation2]   ;;  %s51_s30 = sshll.u32 %s1981_s3, 4  ;;  %s52_s30 = int_to_ptr.hbm [resolvable:$true] %s51_s30 }
   0xa   :  { %s25_s27 = sshll.u32 %s1540_s6, 4  ;;  %s1541_s11 = smov 32   ;;  %s26_s27 = int_to_ptr.vmem [resolvable:$true] %s25_s27 }
   0xb   :  { %s1542_s12 = smov 2   ;;  %s1543_s0 = smov [#allocation7]  }
   0xc   :  { %31 = dma.hbm_to_vmem [thread:$0]  %s24_s26, 160, %s26_s27, [#allocation3], %s1541_s11, %s1541_s11, %s1542_s12  }
   0xd   :  { %s53_s13 = sshll.u32 %s1543_s0, 4  ;;  %s81_s16 = sshll.u32 %s1985_s7, 4  ;;  %s54_s13 = int_to_ptr.vmem [resolvable:$true] %s53_s13  ;;  %s82_s16 = int_to_ptr.hbm [resolvable:$true] %s81_s16 }
   0xe   :  { %59 = dma.hbm_to_vmem [thread:$0]  %s52_s30, 512, %s54_s13, [#allocation6], %s1537_s21, %s1537_s21, %s1538_s22  }
   0xf   :  { %s1544_s3 = smov [#allocation10]  }
  0x10   :  { %s83_s17 = sshll.u32 %s1544_s3, 4  ;;  %s84_s17 = int_to_ptr.vmem [resolvable:$true] %s83_s17 }
  0x11   :  { %89 = dma.hbm_to_vmem [thread:$0]  %s82_s16, 512, %s84_s17, [#allocation9], %s1537_s21, %s1537_s21, %s1538_s22  }
  0x12   :  { %1528 = dma.done.wait [#allocation3], 160  }
  0x13   :  { %1529 = vsyncadd [#allocation3], 4294967136 }
  0x14   :  { %1530 = dma.done.wait [#allocation6], 1152  }
  0x15   :  { %1531 = vsyncadd [#allocation6], 4294966144 }
  0x16   :  { %1532 = dma.done.wait [#allocation9], 1024  }
  0x17   :  { %1533 = vsyncadd [#allocation9], 4294966272  ;;  %vm136_vm0 = vcmask 254976   ;;  %v1545_v0 = vmov 0.0   ;;  %vm151_vm1 = vcmask 1043456   ;;  %v1641_v2 = vld [vmem:[#allocation7 + $0x18] sm:$0xff] }
  0x18   :  { %137 = vst.msk [vmem:[#allocation11] sm:$0x3] %vm136_vm0, %v1545_v0  ;;  %v1639_v1 = vld [vmem:[#allocation5 + $0x20] sm:$0xf]  ;;  %v1643_v3 = vld [vmem:[#allocation5 + $0x18] sm:$0xff]  ;;  %194 = vmatpush.msra.mxu1 %v1641_v2  ;;  %v1650_v5 = vld [vmem:[#allocation5 + $0x10] sm:$0xff] }
  0x19   :  { %138 = vst.msk [vmem:[#allocation11 + $0x2] sm:$0x3] %vm136_vm0, %v1545_v0  ;;  %1264 = vmatpush.msk.msra.mxu0 %vm151_vm1, %v1639_v1  ;;  %v1648_v4 = vld [vmem:[#allocation7 + $0x10] sm:$0xff]  ;;  %v1652_v6 = vld [vmem:[#allocation7 + $0x8] sm:$0xff]  ;;  %v1656_v7 = vld [vmem:[#allocation5 + $0x8] sm:$0xff]  ;;  %vm178_vm2 = vcmask 261120  }
  0x1a   :  { %195 = vmatpush.msra.mxu1 %v1648_v4  ;;  %v1658_v9 = vld [vmem:[#allocation7] sm:$0xff]  ;;  %v1663_v10 = vld [vmem:[#allocation5] sm:$0xff]  ;;  %v142_v11 = vld [vmem:[#allocation2] sm:$0x3]  ;;  %vm147_vm3 = vcmask 293888   ;;  %s1546_s19 = smov 64  }
  0x1b   :  { %167 = vmatpush.msra.mxu0 %v1643_v3  ;;  %v1679_v12 = vld [vmem:[%s1983_s5] ss:$0 sm:$0xff]  ;;  %v1547_v23 = vmov 0   ;;  %v1702_v43 = vld [vmem:[#allocation10 + $0x18] sm:$0xff]  ;;  %v1704_v44 = vld [vmem:[#allocation10 + $0x10] sm:$0xff]  ;;  %s1248_s6 = sshll.u32 %s1988_s10, 4  ;;  %s1249_s6 = int_to_ptr.hbm [resolvable:$true] %s1248_s6 }
  0x1c   :  { %196 = vmatpush.msra.mxu1 %v1652_v6  ;;  %v1686_v15 = vld [vmem:[%s1982_s4] ss:$0 sm:$0xff]  ;;  %1317 = vset.pattern.permute.xlu1 %v1547_v23  ;;  %v1707_v45 = vld [vmem:[#allocation8 + $0x18] sm:$0xff]  ;;  %v1709_v46 = vld [vmem:[#allocation8 + $0x10] sm:$0xff] }
  0x1d   :  { %168 = vmatpush.msra.mxu0 %v1650_v5  ;;  %v1692_v22 = vld [vmem:[%s1979_s1] sm:$0x3]  ;;  %1318 = vset.pattern.permute.xlu2 %v1547_v23  ;;  %s1548_s1 = smov 96   ;;  %v1720_v49 = vld [vmem:[#allocation10] sm:$0xff]  ;;  %v378_v62 = vld [vmem:[#allocation2 + $0x2] sm:$0x3] }
  0x1e   :  { %197 = vmatpush.msra.mxu1 %v1658_v9  ;;  %vm139_vm4 = vcmp.gt.f32.partialorder %v1692_v22, 0.0  ;;  %1319 = vset.pattern.permute.xlu0 %v1547_v23  ;;  %v1712_v47 = vld [vmem:[#allocation10 + $0x8] sm:$0xff]  ;;  %v1725_v50 = vld [vmem:[#allocation8] sm:$0xff]  ;;  %vm374_vm9 = vcmp.gt.f32.partialorder %v1692_v22, 1.0 }
  0x1f   :  { %v143_v8 = vld [vmem:[#allocation11] sm:$0x3]  ;;  %169 = vmatpush.msra.mxu0 %v1656_v7  ;;  %v1263_v24 = vsel %vm139_vm4, 1.0, %v1545_v0  ;;  %312 = vmatpush.msra.mxu3 %v1702_v43  ;;  %v1717_v48 = vld [vmem:[#allocation8 + $0x8] sm:$0xff] }
  0x20   :  { %239 = vrot.lane.b32.xlu2 %v143_v8, %s1541_s11  ;;  %1266 = vmatmul.msk.f32.vlgmr.msra.gmra.mxu1 %vm178_vm2, %v143_v8  ;;  %v250_v25 = vsub.f32 1.0, %v1263_v24  ;;  %v1731_v51 = vld [vmem:[#allocation11 + $0x2] sm:$0x3]  ;;  %v1766_v63 = vld [vmem:[%s1987_s9] ss:$0 sm:$0xff] }
  0x21   :  { %170 = vmatpush.msra.mxu0 %v1663_v10  ;;  %1272 = vmatpush.msk.msrb.mxu1 %vm151_vm1, %v1639_v1 }
  0x22   :  { %1265 = vmatmul.msk.f32.vlgmr.msra.gmra.mxu0 %vm147_vm3, %v142_v11  ;;  %253 = vperm.xlu1 %1317, %v250_v25  }
  0x23   :  { %395 = vmatpush.msrb.mxu1 %v1643_v3  ;;  %529 = vmatpush.msrb.mxu0 %v1702_v43 }
  0x24   :  { %286 = vmatpush.msra.mxu2 %v1707_v45  ;;  %313 = vmatpush.msra.mxu3 %v1704_v44 }
  0x25   :  { %396 = vmatpush.msrb.mxu1 %v1650_v5  ;;  %530 = vmatpush.msrb.mxu0 %v1704_v44 }
  0x26   :  { %287 = vmatpush.msra.mxu2 %v1709_v46  ;;  %314 = vmatpush.msra.mxu3 %v1712_v47 }
  0x27   :  { %397 = vmatpush.msrb.mxu1 %v1656_v7  ;;  %531 = vmatpush.msrb.mxu0 %v1712_v47 }
  0x28   :  { %246 = vperm.xlu2 %1318, %v1263_v24   ;;  %288 = vmatpush.msra.mxu2 %v1717_v48  ;;  %v1271_v24 = vsel %vm374_vm9, 1.0, %v1545_v0 }
  0x29   :  { %398 = vmatpush.msrb.mxu1 %v1663_v10  ;;  %315 = vmatpush.msra.mxu3 %v1720_v49 }
  0x2a   :  { %532 = vmatpush.msrb.mxu0 %v1720_v49  ;;  %1269 = vmatmul.msk.f32.vlgmr.msra.gmra.mxu3 %vm178_vm2, %v1731_v51 }
  0x2b   :  { %746 = vmatpush.msra.mxu1 %v1702_v43  ;;  %289 = vmatpush.msra.mxu2 %v1725_v50 }
  0x2c   :  { %506 = vmatpush.msrb.mxu3 %v1707_v45  ;;  %723 = vmatpush.msra.mxu0 %v1707_v45 }
  0x2d   :  { %747 = vmatpush.msra.mxu1 %v1704_v44  ;;  %418 = vmatpush.msrb.mxu2 %v1641_v2 }
  0x2e   :  { %507 = vmatpush.msrb.mxu3 %v1709_v46  ;;  %724 = vmatpush.msra.mxu0 %v1709_v46 }
  0x2f   :  { %748 = vmatpush.msra.mxu1 %v1712_v47  ;;  %419 = vmatpush.msrb.mxu2 %v1648_v4 }
  0x30   :  { %508 = vmatpush.msrb.mxu3 %v1717_v48  ;;  %725 = vmatpush.msra.mxu0 %v1717_v48 }
  0x31   :  { %749 = vmatpush.msra.mxu1 %v1720_v49  ;;  %420 = vmatpush.msrb.mxu2 %v1652_v6 }
  0x32   :  { %509 = vmatpush.msrb.mxu3 %v1725_v50  ;;  %726 = vmatpush.msra.mxu0 %v1725_v50 }
  0x33   :  { %421 = vmatpush.msrb.mxu2 %v1658_v9  ;;  %1273 = vmatmul.msk.f32.vlgmr.msrb.gmra.mxu1 %vm147_vm3, %v378_v62 }
  0x34   :  { %635 = vmatpush.msra.mxu3 %v1641_v2  ;;  %940 = vmatpush.msrb.mxu1 %v1707_v45 }
  0x36   :  { %636 = vmatpush.msra.mxu3 %v1648_v4  ;;  %941 = vmatpush.msrb.mxu1 %v1709_v46 }
  0x38   :  { %637 = vmatpush.msra.mxu3 %v1652_v6  ;;  %942 = vmatpush.msrb.mxu1 %v1717_v48 }
  0x3a   :  { %638 = vmatpush.msra.mxu3 %v1658_v9  ;;  %943 = vmatpush.msrb.mxu1 %v1725_v50 }
  0x7a   :  { %v240_v52 = vpop.permute.xlu2 %239 }
  0x82   :  { %v1754_v57 = vpop.permute.xlu2 %246 }
  0x94   :  { %v1697_v38 = vpop.permute.xlu1 %253 }
  0x95   :  { %v256_v39 = vmul.f32 %v1697_v38, %v143_v8 }
  0x9d   :  { %v199_v13 = vpop.f32.mrf.mxu1 }
  0x9e   :  { %v200_v14 = vadd.f32 %v1679_v12, %v199_v13 }
  0x9f   :  { %v172_v16 = vpop.f32.mrf.mxu0 }
  0xa0   :  { %223 = vrot.lane.b32.xlu0 %v200_v14, %s1546_s19  ;;  %v173_v17 = vadd.f32 %v1686_v15, %v172_v16  ;;  %v1789_v16 = vld [vmem:[%s1986_s8] ss:$0 sm:$0xff]  ;;  %s1549_s8 = smov [#allocation11]  }
  0xa1   :  { %s1246_s25 = sshll.u32 %s1549_s8, 4  ;;  %s1247_s25 = int_to_ptr.vmem [resolvable:$true] %s1246_s25 }
  0xa2   :  { %v202_v18 = vadd.f32 %v200_v14, %v173_v17 }
  0xa4   :  { %v1267_v19 = vmul.f32 -1.442695, %v202_v18 }
  0xa6   :  { %1324 = vpow2.f32 %v1267_v19 }
  0xac   :  { %v1325_v20 = vpop.eup %1324 }
  0xad   :  { %v206_v21 = vadd.f32 1.0, %v1325_v20  ;;  %v317_v8 = vpop.f32.mrf.mxu3 }
  0xae   :  { %v318_v11 = vadd.f32 %v1766_v63, %v317_v8 }
  0xaf   :  { %1326 = vrcp.f32 %v206_v21  ;;  %v218_v31 = vand.u32 2147483648, %v206_v21  ;;  %vm212_vm6 = vweird.f32 %v206_v21  ;;  %v216_v32 = vand.u32 2147483647, %v206_v21 }
  0xb0   :  { %341 = vrot.lane.b32.xlu2 %v318_v11, %s1546_s19 }
  0xb1   :  { %v219_v34 = vor.u32 1.1754944e-38, %v218_v31  ;;  %vm217_vm8 = vcmp.eq.f32.partialorder %v216_v32, 8.507059e+37 }
  0xb5   :  { %v1327_v26 = vpop.eup %1326 }
  0xb6   :  { %v208_v27 = vmul.f32 %v1327_v26, %v206_v21  ;;  %vm213_vm5 = vweird.f32 %v1327_v26 }
  0xb7   :  { %vm214_vm7 = vmor %vm212_vm6, %vm213_vm5  ;;  %vm591_vm6 = vcmp.gt.f32.partialorder %v1692_v22, 2.0 }
  0xb8   :  { %v209_v28 = vsub.f32 1.0, %v208_v27  ;;  %v474_v27 = vsub.f32 1.0, %v1271_v24 }
  0xba   :  { %v210_v29 = vmul.f32 %v1327_v26, %v209_v28 }
  0xbc   :  { %v211_v30 = vadd.f32 %v1327_v26, %v210_v29 }
  0xbe   :  { %v215_v33 = vsel %vm214_vm7, %v1327_v26, %v211_v30 }
  0xbf   :  { %v220_v35 = vsel %vm217_vm8, %v219_v34, %v215_v33 }
  0xc0   :  { %v233_v53 = vsub.f32 1.0, %v220_v35  ;;  %v242_v55 = vmul.f32 %v240_v52, %v220_v35 }
 0x112   :  { %v224_v36 = vpop.permute.xlu0 %223 }
 0x113   :  { %v226_v37 = vmul.f32 %v224_v36, %v220_v35  ;;  %v342_v35 = vpop.permute.xlu2 %341 }
 0x115   :  { %228 = vrot.lane.b32.xlu0 %v226_v37, %s1546_s19 }
 0x11d   :  { %258 = vrot.lane.b32.xlu0 %v256_v39, %s1541_s11 }
 0x187   :  { %v229_v40 = vpop.permute.xlu0 %228 }
 0x188   :  { %v231_v41 = vadd.f32 %v229_v40, %v173_v17 }
 0x18a   :  { %1328 = vtanh.f32 %v231_v41  ;;  %v400_v41 = vpop.f32.mrf.mxu1 }
 0x18f   :  { %v259_v59 = vpop.permute.xlu0 %258 }
 0x190   :  { %v1329_v42 = vpop.eup %1328 }
 0x191   :  { %235 = vrot.lane.b32.xlu1 %v1329_v42, %s1548_s1  ;;  %v401_v42 = vadd.f32 %v1686_v15, %v400_v41 }
 0x203   :  { %v236_v54 = vpop.permute.xlu1 %235 }
 0x204   :  { %v238_v56 = vmul.f32 %v236_v54, %v233_v53 }
 0x206   :  { %v243_v58 = vadd.f32 %v242_v55, %v238_v56 }
 0x208   :  { %v249_v60 = vmul.f32 %v1754_v57, %v243_v58 }
 0x20a   :  { %v261_v61 = vadd.f32 %v259_v59, %v249_v60 }
 0x20c   :  { %263 = vrot.lane.b32.xlu1 %v261_v61, %s1548_s1 }
 0x27e   :  { %v264_v13 = vpop.permute.xlu1 %263 }
 0x27f   :  { %266 = vst.msk [vmem:[#allocation11] sm:$0x3] %vm136_vm0, %v264_v13  ;;  %1268 = vmatmul.msk.f32.vlgmr.msra.gmra.mxu2 %vm178_vm2, %v264_v13 }
 0x280   :  { %1280 = vmatpush.msk.msra.mxu2 %vm151_vm1, %v1639_v1 }
 0x282   :  { %612 = vmatpush.msra.mxu2 %v1643_v3 }
 0x284   :  { %613 = vmatpush.msra.mxu2 %v1650_v5 }
 0x286   :  { %v1776_v14 = vld [vmem:[#allocation11] sm:$0x3]  ;;  %614 = vmatpush.msra.mxu2 %v1656_v7 }
 0x287   :  { %1274 = vmatmul.msk.f32.vlgmr.msrb.gmra.mxu2 %vm178_vm2, %v1776_v14 }
 0x288   :  { %615 = vmatpush.msra.mxu2 %v1663_v10 }
 0x28a   :  { %963 = vmatpush.msrb.mxu2 %v1702_v43 }
 0x28c   :  { %964 = vmatpush.msrb.mxu2 %v1704_v44 }
 0x28e   :  { %965 = vmatpush.msrb.mxu2 %v1712_v47 }
 0x290   :  { %966 = vmatpush.msrb.mxu2 %v1720_v49 }
 0x302   :  { %v291_v17 = vpop.f32.mrf.mxu2 }
 0x303   :  { %v292_v18 = vadd.f32 %v1789_v16, %v291_v17 }
 0x305   :  { %v320_v19 = vadd.f32 %v318_v11, %v292_v18 }
 0x307   :  { %v1270_v20 = vmul.f32 -1.442695, %v320_v19 }
 0x309   :  { %1330 = vpow2.f32 %v1270_v20 }
 0x30a   :  { %v423_v21 = vpop.f32.mrf.mxu2 }
 0x30b   :  { %v424_v23 = vadd.f32 %v1679_v12, %v423_v21 }
 0x30d   :  { %447 = vrot.lane.b32.xlu0 %v424_v23, %s1546_s19  ;;  %v426_v52 = vadd.f32 %v424_v23, %v401_v42 }
 0x30f   :  { %v1331_v25 = vpop.eup %1330  ;;  %v1275_v53 = vmul.f32 -1.442695, %v426_v52 }
 0x310   :  { %v324_v26 = vadd.f32 1.0, %v1331_v25 }
 0x312   :  { %1332 = vrcp.f32 %v324_v26  ;;  %v336_v31 = vand.u32 2147483648, %v324_v26  ;;  %v334_v33 = vand.u32 2147483647, %v324_v26  ;;  %vm330_vm11 = vweird.f32 %v324_v26 }
 0x313   :  { %1334 = vpow2.f32 %v1275_v53 }
 0x314   :  { %v337_v36 = vor.u32 1.1754944e-38, %v336_v31  ;;  %vm335_vm13 = vcmp.eq.f32.partialorder %v334_v33, 8.507059e+37 }
 0x315   :  { %477 = vperm.xlu0 %1319, %v474_v27  }
 0x318   :  { %v1333_v28 = vpop.eup %1332 }
 0x319   :  { %v326_v29 = vmul.f32 %v1333_v28, %v324_v26  ;;  %vm331_vm10 = vweird.f32 %v1333_v28  ;;  %v1335_v54 = vpop.eup %1334  ;;  %v363_v26 = vmul.f32 %v1731_v51, %v1697_v38 }
 0x31a   :  { %vm332_vm12 = vmor %vm330_vm11, %vm331_vm10  ;;  %v430_v55 = vadd.f32 1.0, %v1335_v54 }
 0x31b   :  { %v327_v30 = vsub.f32 1.0, %v326_v29 }
 0x31c   :  { %1336 = vrcp.f32 %v430_v55  ;;  %v442_v62 = vand.u32 2147483648, %v430_v55  ;;  %vm436_vm15 = vweird.f32 %v430_v55  ;;  %v440_v8 = vand.u32 2147483647, %v430_v55 }
 0x31d   :  { %463 = vrot.lane.b32.xlu0 %v1776_v14, %s1541_s11  ;;  %v328_v32 = vmul.f32 %v1333_v28, %v327_v30 }
 0x31e   :  { %v443_v13 = vor.u32 1.1754944e-38, %v442_v62  ;;  %vm441_vm5 = vcmp.eq.f32.partialorder %v440_v8, 8.507059e+37 }
 0x31f   :  { %v329_v34 = vadd.f32 %v1333_v28, %v328_v32 }
 0x321   :  { %v333_v37 = vsel %vm332_vm12, %v1333_v28, %v329_v34 }
 0x322   :  { %v338_v39 = vsel %vm335_vm13, %v337_v36, %v333_v37  ;;  %v1337_v56 = vpop.eup %1336 }
 0x323   :  { %v344_v40 = vmul.f32 %v342_v35, %v338_v39  ;;  %v432_v58 = vmul.f32 %v1337_v56, %v430_v55  ;;  %vm437_vm14 = vweird.f32 %v1337_v56  ;;  %v351_v32 = vsub.f32 1.0, %v338_v39 }
 0x324   :  { %vm438_vm4 = vmor %vm436_vm15, %vm437_vm14 }
 0x325   :  { %346 = vrot.lane.b32.xlu1 %v344_v40, %s1546_s19  ;;  %v433_v59 = vsub.f32 1.0, %v432_v58  ;;  %v595_v58 = vld [vmem:[#allocation2 + $0x4] sm:$0x3] }
 0x326   :  { %1281 = vmatmul.msk.f32.vlgmr.msra.gmra.mxu2 %vm147_vm3, %v595_v58 }
 0x327   :  { %v434_v60 = vmul.f32 %v1337_v56, %v433_v59  ;;  %1157 = vmatpush.msra.mxu2 %v1707_v45 }
 0x329   :  { %v435_v61 = vadd.f32 %v1337_v56, %v434_v60  ;;  %1158 = vmatpush.msra.mxu2 %v1709_v46 }
 0x32b   :  { %v439_v11 = vsel %vm438_vm4, %v1337_v56, %v435_v61  ;;  %1159 = vmatpush.msra.mxu2 %v1717_v48 }
 0x32c   :  { %v444_v19 = vsel %vm441_vm5, %v443_v13, %v439_v11 }
 0x32d   :  { %v457_v40 = vsub.f32 1.0, %v444_v19  ;;  %1160 = vmatpush.msra.mxu2 %v1725_v50 }
 0x37f   :  { %v448_v17 = vpop.permute.xlu0 %447 }
 0x380   :  { %v450_v20 = vmul.f32 %v448_v17, %v444_v19 }
 0x382   :  { %452 = vrot.lane.b32.xlu2 %v450_v20, %s1546_s19 }
 0x387   :  { %v1808_v30 = vpop.permute.xlu0 %477 }
 0x38a   :  { %357 = vrot.lane.b32.xlu2 %v1731_v51, %s1541_s11 }
 0x38f   :  { %v464_v37 = vpop.permute.xlu0 %463 }
 0x397   :  { %v347_v21 = vpop.permute.xlu1 %346 }
 0x398   :  { %v349_v23 = vadd.f32 %v347_v21, %v292_v18  ;;  %v480_v18 = vmul.f32 %v1808_v30, %v1776_v14 }
 0x39a   :  { %1338 = vtanh.f32 %v349_v23 }
 0x3a0   :  { %v1339_v25 = vpop.eup %1338 }
 0x3a1   :  { %353 = vrot.lane.b32.xlu1 %v1339_v25, %s1548_s1 }
 0x3a9   :  { %365 = vrot.lane.b32.xlu1 %v363_v26, %s1541_s11 }
 0x3b1   :  { %470 = vperm.xlu1 %1317, %v1271_v24  }
 0x3dc   :  { %v453_v27 = vpop.permute.xlu2 %452 }
 0x3dd   :  { %v455_v28 = vadd.f32 %v453_v27, %v401_v42  ;;  %v466_v42 = vmul.f32 %v464_v37, %v444_v19 }
 0x3df   :  { %1340 = vtanh.f32 %v455_v28 }
 0x3e4   :  { %v358_v31 = vpop.permute.xlu2 %357 }
 0x3e5   :  { %v1341_v29 = vpop.eup %1340  ;;  %v360_v38 = vmul.f32 %v358_v31, %v338_v39 }
 0x3e6   :  { %459 = vrot.lane.b32.xlu2 %v1341_v29, %s1548_s1 }
 0x3ee   :  { %482 = vrot.lane.b32.xlu2 %v480_v18, %s1541_s11 }
 0x413   :  { %v354_v33 = vpop.permute.xlu1 %353 }
 0x414   :  { %v356_v51 = vmul.f32 %v354_v33, %v351_v32 }
 0x416   :  { %v361_v34 = vadd.f32 %v360_v38, %v356_v51 }
 0x418   :  { %v362_v24 = vmul.f32 %v361_v34, %v1754_v57 }
 0x41b   :  { %v366_v35 = vpop.permute.xlu1 %365 }
 0x41c   :  { %v368_v36 = vadd.f32 %v366_v35, %v362_v24 }
 0x41e   :  { %370 = vrot.lane.b32.xlu0 %v368_v36, %s1548_s1 }
 0x423   :  { %v1815_v53 = vpop.permute.xlu1 %470 }
 0x440   :  { %v460_v41 = vpop.permute.xlu2 %459 }
 0x441   :  { %v462_v52 = vmul.f32 %v460_v41, %v457_v40 }
 0x443   :  { %v467_v14 = vadd.f32 %v466_v42, %v462_v52 }
 0x445   :  { %v473_v54 = vmul.f32 %v1815_v53, %v467_v14 }
 0x448   :  { %v483_v55 = vpop.permute.xlu2 %482 }
 0x449   :  { %v485_v39 = vadd.f32 %v483_v55, %v473_v54 }
 0x44b   :  { %487 = vrot.lane.b32.xlu1 %v485_v39, %s1548_s1 }
 0x490   :  { %v371_v56 = vpop.permute.xlu0 %370 }
 0x491   :  { %373 = vst.msk [vmem:[#allocation11 + $0x2] sm:$0x3] %vm136_vm0, %v371_v56 }
 0x498   :  { %v1820_v57 = vld [vmem:[#allocation11 + $0x2] sm:$0x3] }
 0x499   :  { %1277 = vmatmul.msk.f32.vlgmr.msrb.gmra.mxu0 %vm178_vm2, %v1820_v57  ;;  %v580_v13 = vmul.f32 %v1820_v57, %v1808_v30  ;;  %v617_v30 = vpop.f32.mrf.mxu2 }
 0x49a   :  { %852 = vmatpush.msrb.mxu0 %v1641_v2  ;;  %v618_v32 = vadd.f32 %v1686_v15, %v617_v30 }
 0x49c   :  { %853 = vmatpush.msrb.mxu0 %v1648_v4 }
 0x49e   :  { %854 = vmatpush.msrb.mxu0 %v1652_v6 }
 0x4a0   :  { %855 = vmatpush.msrb.mxu0 %v1658_v9 }
 0x4bd   :  { %v488_v59 = vpop.permute.xlu1 %487 }
 0x4be   :  { %490 = vst.msk [vmem:[#allocation11] sm:$0x3] %vm136_vm0, %v488_v59  ;;  %1276 = vmatmul.msk.f32.vlgmr.msrb.gmra.mxu3 %vm178_vm2, %v488_v59 }
 0x4bf   :  { %1288 = vmatpush.msk.msrb.mxu3 %vm151_vm1, %v1639_v1 }
 0x4c1   :  { %829 = vmatpush.msrb.mxu3 %v1643_v3 }
 0x4c3   :  { %830 = vmatpush.msrb.mxu3 %v1650_v5 }
 0x4c5   :  { %v1839_v60 = vld [vmem:[#allocation11] sm:$0x3]  ;;  %831 = vmatpush.msrb.mxu3 %v1656_v7 }
 0x4c6   :  { %1282 = vmatmul.msk.f32.vlgmr.msra.gmra.mxu3 %vm178_vm2, %v1839_v60 }
 0x4c7   :  { %832 = vmatpush.msrb.mxu3 %v1663_v10 }
 0x4c9   :  { %1180 = vmatpush.msra.mxu3 %v1702_v43 }
 0x4cb   :  { %1181 = vmatpush.msra.mxu3 %v1704_v44  ;;  %v1279_v44 = vsel %vm591_vm6, 1.0, %v1545_v0 }
 0x4cd   :  { %1182 = vmatpush.msra.mxu3 %v1712_v47 }
 0x4cf   :  { %1183 = vmatpush.msra.mxu3 %v1720_v49  ;;  %v691_v49 = vsub.f32 1.0, %v1279_v44 }
 0x516   :  { %v534_v45 = vpop.f32.mrf.mxu0 }
 0x517   :  { %v535_v46 = vadd.f32 %v1766_v63, %v534_v45 }
 0x519   :  { %558 = vrot.lane.b32.xlu2 %v535_v46, %s1546_s19 }
 0x541   :  { %v511_v48 = vpop.f32.mrf.mxu3 }
 0x542   :  { %v512_v50 = vadd.f32 %v1789_v16, %v511_v48 }
 0x544   :  { %v537_v61 = vadd.f32 %v535_v46, %v512_v50 }
 0x546   :  { %v1278_v62 = vmul.f32 -1.442695, %v537_v61 }
 0x548   :  { %1342 = vpow2.f32 %v1278_v62 }
 0x549   :  { %v640_v8 = vpop.f32.mrf.mxu3 }
 0x54a   :  { %v641_v43 = vadd.f32 %v1679_v12, %v640_v8 }
 0x54c   :  { %664 = vrot.lane.b32.xlu0 %v641_v43, %s1546_s19  ;;  %v643_v33 = vadd.f32 %v641_v43, %v618_v32 }
 0x54e   :  { %v1343_v47 = vpop.eup %1342  ;;  %v1283_v38 = vmul.f32 -1.442695, %v643_v33 }
 0x54f   :  { %v541_v11 = vadd.f32 1.0, %v1343_v47 }
 0x551   :  { %1344 = vrcp.f32 %v541_v11  ;;  %v553_v25 = vand.u32 2147483648, %v541_v11  ;;  %vm547_vm8 = vweird.f32 %v541_v11  ;;  %v551_v26 = vand.u32 2147483647, %v541_v11 }
 0x552   :  { %1346 = vpow2.f32 %v1283_v38 }
 0x553   :  { %v554_v28 = vor.u32 1.1754944e-38, %v553_v25  ;;  %vm552_vm10 = vcmp.eq.f32.partialorder %v551_v26, 8.507059e+37 }
 0x554   :  { %694 = vperm.xlu0 %1319, %v691_v49  }
 0x557   :  { %v1345_v17 = vpop.eup %1344 }
 0x558   :  { %v543_v19 = vmul.f32 %v1345_v17, %v541_v11  ;;  %vm548_vm7 = vweird.f32 %v1345_v17  ;;  %v1347_v51 = vpop.eup %1346 }
 0x559   :  { %vm549_vm9 = vmor %vm547_vm8, %vm548_vm7  ;;  %v647_v34 = vadd.f32 1.0, %v1347_v51 }
 0x55a   :  { %v544_v20 = vsub.f32 1.0, %v543_v19 }
 0x55b   :  { %1348 = vrcp.f32 %v647_v34  ;;  %v659_v41 = vand.u32 2147483648, %v647_v34  ;;  %vm653_vm12 = vweird.f32 %v647_v34  ;;  %v657_v42 = vand.u32 2147483647, %v647_v34 }
 0x55c   :  { %582 = vrot.lane.b32.xlu0 %v580_v13, %s1541_s11  ;;  %v545_v21 = vmul.f32 %v1345_v17, %v544_v20 }
 0x55d   :  { %v660_v14 = vor.u32 1.1754944e-38, %v659_v41  ;;  %vm658_vm14 = vcmp.eq.f32.partialorder %v657_v42, 8.507059e+37 }
 0x55e   :  { %v546_v23 = vadd.f32 %v1345_v17, %v545_v21 }
 0x560   :  { %v550_v27 = vsel %vm549_vm9, %v1345_v17, %v546_v23 }
 0x561   :  { %v555_v29 = vsel %vm552_vm10, %v554_v28, %v550_v27  ;;  %v1349_v24 = vpop.eup %1348 }
 0x562   :  { %v649_v35 = vmul.f32 %v1349_v24, %v647_v34  ;;  %vm654_vm11 = vweird.f32 %v1349_v24  ;;  %v568_v8 = vsub.f32 1.0, %v555_v29 }
 0x563   :  { %vm655_vm13 = vmor %vm653_vm12, %vm654_vm11 }
 0x564   :  { %687 = vperm.xlu0 %1319, %v1279_v44   ;;  %v650_v36 = vsub.f32 1.0, %v649_v35 }
 0x566   :  { %v651_v37 = vmul.f32 %v1349_v24, %v650_v36 }
 0x568   :  { %v652_v40 = vadd.f32 %v1349_v24, %v651_v37 }
 0x56a   :  { %v656_v52 = vsel %vm655_vm13, %v1349_v24, %v652_v40 }
 0x56b   :  { %v661_v55 = vsel %vm658_vm14, %v660_v14, %v656_v52 }
 0x56c   :  { %v674_v19 = vsub.f32 1.0, %v661_v55 }
 0x573   :  { %v559_v18 = vpop.permute.xlu2 %558 }
 0x574   :  { %v561_v31 = vmul.f32 %v559_v18, %v555_v29  ;;  %v812_v18 = vld [vmem:[#allocation2 + $0x6] sm:$0x3] }
 0x575   :  { %1289 = vmatmul.msk.f32.vlgmr.msrb.gmra.mxu3 %vm147_vm3, %v812_v18 }
 0x576   :  { %563 = vrot.lane.b32.xlu1 %v561_v31, %s1546_s19 }
 0x5be   :  { %v665_v54 = vpop.permute.xlu0 %664 }
 0x5bf   :  { %v667_v39 = vmul.f32 %v665_v54, %v661_v55 }
 0x5c1   :  { %669 = vrot.lane.b32.xlu2 %v667_v39, %s1546_s19 }
 0x5c6   :  { %v695_v61 = vpop.permute.xlu0 %694 }
 0x5c7   :  { %v697_v62 = vmul.f32 %v695_v61, %v1839_v60 }
 0x5c9   :  { %574 = vrot.lane.b32.xlu2 %v1820_v57, %s1541_s11 }
 0x5ce   :  { %v583_v11 = vpop.permute.xlu0 %582 }
 0x5d1   :  { %680 = vrot.lane.b32.xlu2 %v1839_v60, %s1541_s11 }
 0x5d6   :  { %v1872_v25 = vpop.permute.xlu0 %687 }
 0x5e8   :  { %v564_v56 = vpop.permute.xlu1 %563 }
 0x5e9   :  { %v566_v58 = vadd.f32 %v564_v56, %v512_v50 }
 0x5eb   :  { %1350 = vtanh.f32 %v566_v58 }
 0x5f1   :  { %v1351_v59 = vpop.eup %1350 }
 0x5f2   :  { %570 = vrot.lane.b32.xlu1 %v1351_v59, %s1548_s1 }
 0x5f8   :  { %v834_v42 = vpop.f32.mrf.mxu3 }
 0x5f9   :  { %v835_v54 = vadd.f32 %v1686_v15, %v834_v42 }
 0x61b   :  { %v670_v45 = vpop.permute.xlu2 %669 }
 0x61c   :  { %v672_v46 = vadd.f32 %v670_v45, %v618_v32 }
 0x61e   :  { %1352 = vtanh.f32 %v672_v46 }
 0x623   :  { %v575_v57 = vpop.permute.xlu2 %574 }
 0x624   :  { %v1353_v48 = vpop.eup %1352  ;;  %v577_v44 = vmul.f32 %v575_v57, %v555_v29 }
 0x625   :  { %676 = vrot.lane.b32.xlu1 %v1353_v48, %s1548_s1 }
 0x62b   :  { %v681_v17 = vpop.permute.xlu2 %680 }
 0x62c   :  { %v683_v21 = vmul.f32 %v681_v17, %v661_v55 }
 0x62d   :  { %699 = vrot.lane.b32.xlu1 %v697_v62, %s1541_s11 }
 0x664   :  { %v571_v43 = vpop.permute.xlu1 %570 }
 0x665   :  { %v573_v50 = vmul.f32 %v571_v43, %v568_v8 }
 0x667   :  { %v578_v47 = vadd.f32 %v577_v44, %v573_v50 }
 0x669   :  { %v579_v49 = vmul.f32 %v578_v47, %v1815_v53 }
 0x66b   :  { %v585_v13 = vadd.f32 %v583_v11, %v579_v49 }
 0x66d   :  { %587 = vrot.lane.b32.xlu2 %v585_v13, %s1548_s1 }
 0x697   :  { %v677_v20 = vpop.permute.xlu1 %676 }
 0x698   :  { %v679_v23 = vmul.f32 %v677_v20, %v674_v19 }
 0x69a   :  { %v684_v60 = vadd.f32 %v683_v21, %v679_v23 }
 0x69c   :  { %v690_v26 = vmul.f32 %v1872_v25, %v684_v60 }
 0x69f   :  { %v700_v27 = vpop.permute.xlu1 %699 }
 0x6a0   :  { %v702_v28 = vadd.f32 %v700_v27, %v690_v26 }
 0x6a2   :  { %704 = vrot.lane.b32.xlu0 %v702_v28, %s1548_s1 }
 0x6c7   :  { %v588_v29 = vpop.permute.xlu2 %587 }
 0x6c8   :  { %590 = vst.msk [vmem:[#allocation11 + $0x2] sm:$0x3] %vm136_vm0, %v588_v29 }
 0x6cf   :  { %v1877_v53 = vld [vmem:[#allocation11 + $0x2] sm:$0x3] }
 0x6d0   :  { %1285 = vmatmul.msk.f32.vlgmr.msra.gmra.mxu1 %vm178_vm2, %v1877_v53  ;;  %v797_v51 = vmul.f32 %v1877_v53, %v695_v61 }
 0x6d1   :  { %1069 = vmatpush.msra.mxu1 %v1641_v2 }
 0x6d3   :  { %1070 = vmatpush.msra.mxu1 %v1648_v4 }
 0x6d5   :  { %1071 = vmatpush.msra.mxu1 %v1652_v6 }
 0x6d7   :  { %1072 = vmatpush.msra.mxu1 %v1658_v9 }
 0x714   :  { %v705_v31 = vpop.permute.xlu0 %704 }
 0x715   :  { %707 = vst.msk [vmem:[#allocation11] sm:$0x3] %vm136_vm0, %v705_v31  ;;  %1284 = vmatmul.msk.f32.vlgmr.msra.gmra.mxu0 %vm178_vm2, %v705_v31 }
 0x716   :  { %1296 = vmatpush.msk.msra.mxu0 %vm151_vm1, %v1639_v1  ;;  %vm808_vm1 = vcmp.gt.f32.partialorder %v1692_v22, 3.0 }
 0x718   :  { %1046 = vmatpush.msra.mxu0 %v1643_v3 }
 0x71a   :  { %1047 = vmatpush.msra.mxu0 %v1650_v5 }
 0x71c   :  { %v1892_v2 = vld [vmem:[#allocation11] sm:$0x3]  ;;  %1048 = vmatpush.msra.mxu0 %v1656_v7  ;;  %v1287_v7 = vsel %vm808_vm1, 1.0, %v1545_v0 }
 0x71d   :  { %1290 = vmatmul.msk.f32.vlgmr.msrb.gmra.mxu0 %vm178_vm2, %v1892_v2  ;;  %v908_v33 = vsub.f32 1.0, %v1287_v7 }
 0x71e   :  { %1049 = vmatpush.msra.mxu0 %v1663_v10 }
 0x74d   :  { %v751_v4 = vpop.f32.mrf.mxu1 }
 0x74e   :  { %v752_v6 = vadd.f32 %v1766_v63, %v751_v4 }
 0x750   :  { %775 = vrot.lane.b32.xlu1 %v752_v6, %s1546_s19 }
 0x792   :  { %v728_v9 = vpop.f32.mrf.mxu0 }
 0x793   :  { %v729_v1 = vadd.f32 %v1789_v16, %v728_v9 }
 0x795   :  { %v754_v3 = vadd.f32 %v752_v6, %v729_v1 }
 0x797   :  { %v1286_v30 = vmul.f32 -1.442695, %v754_v3 }
 0x799   :  { %1354 = vpow2.f32 %v1286_v30 }
 0x79a   :  { %v857_v5 = vpop.f32.mrf.mxu0 }
 0x79b   :  { %v858_v32 = vadd.f32 %v1679_v12, %v857_v5 }
 0x79d   :  { %881 = vrot.lane.b32.xlu2 %v858_v32, %s1546_s19  ;;  %v860_v58 = vadd.f32 %v858_v32, %v835_v54 }
 0x79f   :  { %v1355_v10 = vpop.eup %1354  ;;  %v1291_v59 = vmul.f32 -1.442695, %v860_v58 }
 0x7a0   :  { %v758_v38 = vadd.f32 1.0, %v1355_v10 }
 0x7a2   :  { %1356 = vrcp.f32 %v758_v38  ;;  %v770_v40 = vand.u32 2147483648, %v758_v38  ;;  %vm764_vm4 = vweird.f32 %v758_v38  ;;  %v768_v41 = vand.u32 2147483647, %v758_v38 }
 0x7a3   :  { %1358 = vpow2.f32 %v1291_v59 }
 0x7a4   :  { %v771_v14 = vor.u32 1.1754944e-38, %v770_v40  ;;  %vm769_vm6 = vcmp.eq.f32.partialorder %v768_v41, 8.507059e+37 }
 0x7a5   :  { %911 = vperm.xlu2 %1318, %v908_v33  }
 0x7a8   :  { %v1357_v34 = vpop.eup %1356 }
 0x7a9   :  { %v760_v24 = vmul.f32 %v1357_v34, %v758_v38  ;;  %vm765_vm15 = vweird.f32 %v1357_v34  ;;  %v1359_v45 = vpop.eup %1358 }
 0x7aa   :  { %vm766_vm5 = vmor %vm764_vm4, %vm765_vm15  ;;  %v864_v46 = vadd.f32 1.0, %v1359_v45 }
 0x7ab   :  { %v761_v35 = vsub.f32 1.0, %v760_v24 }
 0x7ac   :  { %1360 = vrcp.f32 %v864_v46  ;;  %v876_v43 = vand.u32 2147483648, %v864_v46  ;;  %vm870_vm8 = vweird.f32 %v864_v46  ;;  %v874_v44 = vand.u32 2147483647, %v864_v46 }
 0x7ad   :  { %799 = vrot.lane.b32.xlu2 %v797_v51, %s1541_s11  ;;  %v762_v36 = vmul.f32 %v1357_v34, %v761_v35 }
 0x7ae   :  { %v877_v47 = vor.u32 1.1754944e-38, %v876_v43  ;;  %vm875_vm10 = vcmp.eq.f32.partialorder %v874_v44, 8.507059e+37 }
 0x7af   :  { %v763_v37 = vadd.f32 %v1357_v34, %v762_v36 }
 0x7b1   :  { %v767_v52 = vsel %vm766_vm5, %v1357_v34, %v763_v37 }
 0x7b2   :  { %v772_v39 = vsel %vm769_vm6, %v771_v14, %v767_v52  ;;  %v1361_v48 = vpop.eup %1360 }
 0x7b3   :  { %v866_v61 = vmul.f32 %v1361_v48, %v864_v46  ;;  %vm871_vm7 = vweird.f32 %v1361_v48  ;;  %v785_v29 = vsub.f32 1.0, %v772_v39 }
 0x7b4   :  { %vm872_vm9 = vmor %vm870_vm8, %vm871_vm7 }
 0x7b5   :  { %904 = vperm.xlu2 %1318, %v1287_v7   ;;  %v867_v62 = vsub.f32 1.0, %v866_v61 }
 0x7b7   :  { %v868_v57 = vmul.f32 %v1361_v48, %v867_v62 }
 0x7b9   :  { %v869_v8 = vadd.f32 %v1361_v48, %v868_v57 }
 0x7bb   :  { %v873_v50 = vsel %vm872_vm9, %v1361_v48, %v869_v8 }
 0x7bc   :  { %v878_v49 = vsel %vm875_vm10, %v877_v47, %v873_v50 }
 0x7bd   :  { %v891_v30 = vsub.f32 1.0, %v878_v49 }
 0x7c2   :  { %v776_v55 = vpop.permute.xlu1 %775 }
 0x7c3   :  { %v778_v56 = vmul.f32 %v776_v55, %v772_v39 }
 0x7c5   :  { %780 = vrot.lane.b32.xlu0 %v778_v56, %s1546_s19 }
 0x7f7   :  { %v882_v11 = vpop.permute.xlu2 %881 }
 0x7f8   :  { %v884_v13 = vmul.f32 %v882_v11, %v878_v49 }
 0x7fa   :  { %886 = vrot.lane.b32.xlu1 %v884_v13, %s1546_s19 }
 0x7ff   :  { %v912_v26 = vpop.permute.xlu2 %911 }
 0x800   :  { %v914_v27 = vmul.f32 %v912_v26, %v1892_v2 }
 0x802   :  { %791 = vrot.lane.b32.xlu1 %v1877_v53, %s1541_s11 }
 0x807   :  { %v800_v9 = vpop.permute.xlu2 %799 }
 0x80a   :  { %897 = vrot.lane.b32.xlu1 %v1892_v2, %s1541_s11 }
 0x80f   :  { %v1920_v10 = vpop.permute.xlu2 %904 }
 0x837   :  { %v781_v17 = vpop.permute.xlu0 %780 }
 0x838   :  { %v783_v19 = vadd.f32 %v781_v17, %v729_v1 }
 0x83a   :  { %1362 = vtanh.f32 %v783_v19 }
 0x840   :  { %v1363_v20 = vpop.eup %1362 }
 0x841   :  { %787 = vrot.lane.b32.xlu0 %v1363_v20, %s1548_s1 }
 0x86c   :  { %v887_v21 = vpop.permute.xlu1 %886 }
 0x86d   :  { %v889_v23 = vadd.f32 %v887_v21, %v835_v54 }
 0x86f   :  { %1364 = vtanh.f32 %v889_v23 }
 0x874   :  { %v792_v28 = vpop.permute.xlu1 %791 }
 0x875   :  { %v1365_v60 = vpop.eup %1364  ;;  %v794_v18 = vmul.f32 %v792_v28, %v772_v39 }
 0x876   :  { %893 = vrot.lane.b32.xlu0 %v1365_v60, %s1548_s1 }
 0x87c   :  { %v898_v3 = vpop.permute.xlu1 %897 }
 0x87d   :  { %v900_v32 = vmul.f32 %v898_v3, %v878_v49 }
 0x87e   :  { %916 = vrot.lane.b32.xlu0 %v914_v27, %s1541_s11 }
 0x8b3   :  { %v788_v53 = vpop.permute.xlu0 %787 }
 0x8b4   :  { %v790_v31 = vmul.f32 %v788_v53, %v785_v29 }
 0x8b6   :  { %v795_v4 = vadd.f32 %v794_v18, %v790_v31 }
 0x8b8   :  { %v796_v6 = vmul.f32 %v795_v4, %v1872_v25  ;;  %v1029_v25 = vld [vmem:[#allocation2 + $0x8] sm:$0x3] }
 0x8b9   :  { %1297 = vmatmul.msk.f32.vlgmr.msra.gmra.mxu0 %vm147_vm3, %v1029_v25  ;;  %vm1025_vm3 = vcmp.gt.f32.partialorder %v1692_v22, 4.0 }
 0x8ba   :  { %v802_v1 = vadd.f32 %v800_v9, %v796_v6  ;;  %v1295_v14 = vsel %vm1025_vm3, 1.0, %v1545_v0 }
 0x8bb   :  { %v1125_v54 = vsub.f32 1.0, %v1295_v14 }
 0x8bc   :  { %804 = vrot.lane.b32.xlu1 %v802_v1, %s1548_s1 }
 0x8e8   :  { %v894_v5 = vpop.permute.xlu0 %893 }
 0x8e9   :  { %v896_v7 = vmul.f32 %v894_v5, %v891_v30 }
 0x8eb   :  { %v901_v2 = vadd.f32 %v900_v32, %v896_v7 }
 0x8ed   :  { %v907_v33 = vmul.f32 %v1920_v10, %v901_v2 }
 0x8f0   :  { %v917_v38 = vpop.permute.xlu0 %916 }
 0x8f1   :  { %v919_v51 = vadd.f32 %v917_v38, %v907_v33 }
 0x8f3   :  { %921 = vrot.lane.b32.xlu2 %v919_v51, %s1548_s1 }
 0x92e   :  { %v805_v34 = vpop.permute.xlu1 %804 }
 0x92f   :  { %807 = vst.msk [vmem:[#allocation11 + $0x2] sm:$0x3] %vm136_vm0, %v805_v34 }
 0x936   :  { %v1926_v24 = vld [vmem:[#allocation11 + $0x2] sm:$0x3]  ;;  %v1051_v45 = vpop.f32.mrf.mxu0 }
 0x937   :  { %1293 = vmatmul.msk.f32.vlgmr.msrb.gmra.mxu2 %vm178_vm2, %v1926_v24  ;;  %v1014_v55 = vmul.f32 %v1926_v24, %v912_v26  ;;  %v1052_v22 = vadd.f32 %v1686_v15, %v1051_v45 }
 0x94d   :  { %v922_v35 = vpop.permute.xlu2 %921 }
 0x94e   :  { %924 = vst.msk [vmem:[#allocation11] sm:$0x3] %vm136_vm0, %v922_v35  ;;  %1292 = vmatmul.msk.f32.vlgmr.msrb.gmra.mxu1 %vm178_vm2, %v922_v35 }
 0x955   :  { %v1932_v36 = vld [vmem:[#allocation11] sm:$0x3] }
 0x956   :  { %1298 = vmatmul.msk.f32.vlgmr.msra.gmra.mxu1 %vm178_vm2, %v1932_v36 }
 0x9ba   :  { %v968_v37 = vpop.f32.mrf.mxu2 }
 0x9bb   :  { %v969_v40 = vadd.f32 %v1766_v63, %v968_v37 }
 0x9bd   :  { %992 = vrot.lane.b32.xlu0 %v969_v40, %s1546_s19 }
 0x9cb   :  { %v945_v41 = vpop.f32.mrf.mxu1 }
 0x9cc   :  { %v946_v39 = vadd.f32 %v1789_v16, %v945_v41 }
 0x9ce   :  { %v971_v56 = vadd.f32 %v969_v40, %v946_v39 }
 0x9d0   :  { %v1294_v58 = vmul.f32 -1.442695, %v971_v56 }
 0x9d2   :  { %1366 = vpow2.f32 %v1294_v58 }
 0x9d3   :  { %v1074_v42 = vpop.f32.mrf.mxu1 }
 0x9d4   :  { %v1075_v52 = vadd.f32 %v1679_v12, %v1074_v42 }
 0x9d6   :  { %1098 = vrot.lane.b32.xlu1 %v1075_v52, %s1546_s19  ;;  %v1077_v46 = vadd.f32 %v1075_v52, %v1052_v22 }
 0x9d8   :  { %v1367_v59 = vpop.eup %1366  ;;  %v1299_v48 = vmul.f32 -1.442695, %v1077_v46 }
 0x9d9   :  { %v975_v12 = vadd.f32 1.0, %v1367_v59 }
 0x9db   :  { %1368 = vrcp.f32 %v975_v12  ;;  %v987_v50 = vand.u32 2147483648, %v975_v12  ;;  %vm981_vm12 = vweird.f32 %v975_v12  ;;  %v985_v47 = vand.u32 2147483647, %v975_v12 }
 0x9dc   :  { %1370 = vpow2.f32 %v1299_v48 }
 0x9dd   :  { %v988_v11 = vor.u32 1.1754944e-38, %v987_v50  ;;  %vm986_vm14 = vcmp.eq.f32.partialorder %v985_v47, 8.507059e+37 }
 0x9de   :  { %1128 = vperm.xlu1 %1317, %v1125_v54  }
 0x9e1   :  { %v1369_v0 = vpop.eup %1368 }
 0x9e2   :  { %v977_v61 = vmul.f32 %v1369_v0, %v975_v12  ;;  %v1371_v8 = vpop.eup %1370  ;;  %vm982_vm11 = vweird.f32 %v1369_v0 }
 0x9e3   :  { %v1081_v43 = vadd.f32 1.0, %v1371_v8  ;;  %vm983_vm13 = vmor %vm981_vm12, %vm982_vm11 }
 0x9e4   :  { %v978_v62 = vsub.f32 1.0, %v977_v61 }
 0x9e5   :  { %1372 = vrcp.f32 %v1081_v43  ;;  %v1093_v26 = vand.u32 2147483648, %v1081_v43  ;;  %vm1087_vm15 = vweird.f32 %v1081_v43  ;;  %v1091_v27 = vand.u32 2147483647, %v1081_v43 }
 0x9e6   :  { %1016 = vrot.lane.b32.xlu1 %v1014_v55, %s1541_s11  ;;  %v979_v57 = vmul.f32 %v1369_v0, %v978_v62 }
 0x9e7   :  { %v1094_v29 = vor.u32 1.1754944e-38, %v1093_v26  ;;  %vm1092_vm5 = vcmp.eq.f32.partialorder %v1091_v27, 8.507059e+37 }
 0x9e8   :  { %v980_v44 = vadd.f32 %v1369_v0, %v979_v57 }
 0x9ea   :  { %v984_v49 = vsel %vm983_vm13, %v1369_v0, %v980_v44 }
 0x9eb   :  { %v989_v13 = vsel %vm986_vm14, %v988_v11, %v984_v49  ;;  %v1373_v19 = vpop.eup %1372 }
 0x9ec   :  { %v1083_v20 = vmul.f32 %v1373_v19, %v1081_v43  ;;  %vm1088_vm1 = vweird.f32 %v1373_v19  ;;  %v1002_v2 = vsub.f32 1.0, %v989_v13 }
 0x9ed   :  { %vm1089_vm4 = vmor %vm1087_vm15, %vm1088_vm1 }
 0x9ee   :  { %1121 = vperm.xlu1 %1317, %v1295_v14   ;;  %v1084_v21 = vsub.f32 1.0, %v1083_v20 }
 0x9f0   :  { %v1085_v23 = vmul.f32 %v1373_v19, %v1084_v21 }
 0x9f2   :  { %v1086_v60 = vadd.f32 %v1373_v19, %v1085_v23 }
 0x9f4   :  { %v1090_v28 = vsel %vm1089_vm4, %v1373_v19, %v1086_v60 }
 0x9f5   :  { %v1095_v18 = vsel %vm1092_vm5, %v1094_v29, %v1090_v28 }
 0x9f6   :  { %v1108_v40 = vsub.f32 1.0, %v1095_v18 }
 0xa2f   :  { %v993_v15 = vpop.permute.xlu0 %992 }
 0xa30   :  { %v995_v17 = vmul.f32 %v993_v15, %v989_v13 }
 0xa32   :  { %997 = vrot.lane.b32.xlu2 %v995_v17, %s1546_s19 }
 0xa48   :  { %v1099_v53 = vpop.permute.xlu1 %1098 }
 0xa49   :  { %v1101_v31 = vmul.f32 %v1099_v53, %v1095_v18 }
 0xa4b   :  { %1103 = vrot.lane.b32.xlu0 %v1101_v31, %s1546_s19 }
 0xa50   :  { %v1129_v5 = vpop.permute.xlu1 %1128 }
 0xa51   :  { %v1131_v32 = vmul.f32 %v1129_v5, %v1932_v36 }
 0xa53   :  { %1008 = vrot.lane.b32.xlu0 %v1926_v24, %s1541_s11 }
 0xa58   :  { %v1017_v24 = vpop.permute.xlu1 %1016 }
 0xa5b   :  { %1114 = vrot.lane.b32.xlu0 %v1932_v36, %s1541_s11 }
 0xa60   :  { %v1122_v14 = vpop.permute.xlu1 %1121 }
 0xa8c   :  { %v998_v4 = vpop.permute.xlu2 %997 }
 0xa8d   :  { %v1000_v6 = vadd.f32 %v998_v4, %v946_v39 }
 0xa8f   :  { %1374 = vtanh.f32 %v1000_v6 }
 0xa95   :  { %v1375_v9 = vpop.eup %1374 }
 0xa96   :  { %1004 = vrot.lane.b32.xlu2 %v1375_v9, %s1548_s1 }
 0xabd   :  { %v1104_v1 = vpop.permute.xlu0 %1103 }
 0xabe   :  { %v1106_v3 = vadd.f32 %v1104_v1, %v1052_v22 }
 0xac0   :  { %1376 = vtanh.f32 %v1106_v3 }
 0xac5   :  { %v1009_v7 = vpop.permute.xlu0 %1008 }
 0xac6   :  { %v1377_v30 = vpop.eup %1376  ;;  %v1011_v38 = vmul.f32 %v1009_v7, %v989_v13 }
 0xac7   :  { %1110 = vrot.lane.b32.xlu2 %v1377_v30, %s1548_s1 }
 0xacd   :  { %v1115_v37 = vpop.permute.xlu0 %1114 }
 0xace   :  { %v1117_v42 = vmul.f32 %v1115_v37, %v1095_v18 }
 0xacf   :  { %1133 = vrot.lane.b32.xlu2 %v1131_v32, %s1541_s11 }
 0xaf0   :  { %v1005_v33 = vpop.permute.xlu2 %1004 }
 0xaf1   :  { %v1007_v51 = vmul.f32 %v1005_v33, %v1002_v2 }
 0xaf3   :  { %v1012_v34 = vadd.f32 %v1011_v38, %v1007_v51 }
 0xaf5   :  { %v1013_v25 = vmul.f32 %v1012_v34, %v1920_v10 }
 0xaf7   :  { %v1019_v35 = vadd.f32 %v1017_v24, %v1013_v25 }
 0xaf9   :  { %1021 = vrot.lane.b32.xlu0 %v1019_v35, %s1548_s1 }
 0xb21   :  { %v1111_v41 = vpop.permute.xlu2 %1110 }
 0xb22   :  { %v1113_v52 = vmul.f32 %v1111_v41, %v1108_v40 }
 0xb24   :  { %v1118_v36 = vadd.f32 %v1117_v42, %v1113_v52 }
 0xb26   :  { %v1124_v54 = vmul.f32 %v1122_v14, %v1118_v36 }
 0xb29   :  { %v1134_v55 = vpop.permute.xlu2 %1133 }
 0xb2a   :  { %v1136_v39 = vadd.f32 %v1134_v55, %v1124_v54 }
 0xb2c   :  { %1138 = vrot.lane.b32.xlu1 %v1136_v39, %s1548_s1 }
 0xb6b   :  { %v1022_v56 = vpop.permute.xlu0 %1021 }
 0xb6c   :  { %1024 = vst.msk [vmem:[#allocation11 + $0x2] sm:$0x3] %vm136_vm0, %v1022_v56 }
 0xb73   :  { %v1142_v10 = vld [vmem:[#allocation11 + $0x2] sm:$0x3] }
 0xb74   :  { %1301 = vmatmul.msk.f32.vlgmr.msra.gmra.mxu3 %vm178_vm2, %v1142_v10  ;;  %v1231_v13 = vmul.f32 %v1142_v10, %v1129_v5 }
 0xb9e   :  { %v1139_v58 = vpop.permute.xlu1 %1138 }
 0xb9f   :  { %1141 = vst.msk [vmem:[#allocation11] sm:$0x3] %vm136_vm0, %v1139_v58  ;;  %1300 = vmatmul.msk.f32.vlgmr.msra.gmra.mxu2 %vm178_vm2, %v1139_v58 }
 0xbf7   :  { %v1185_v59 = vpop.f32.mrf.mxu3 }
 0xbf8   :  { %v1186_v12 = vadd.f32 %v1766_v63, %v1185_v59 }
 0xbfa   :  { %1209 = vrot.lane.b32.xlu2 %v1186_v12, %s1546_s19 }
 0xc02   :  { %1225 = vrot.lane.b32.xlu2 %v1142_v10, %s1541_s11 }
 0xc22   :  { %v1162_v45 = vpop.f32.mrf.mxu2 }
 0xc23   :  { %v1163_v22 = vadd.f32 %v1789_v16, %v1162_v45 }
 0xc25   :  { %v1188_v46 = vadd.f32 %v1186_v12, %v1163_v22 }
 0xc27   :  { %v1302_v0 = vmul.f32 -1.442695, %v1188_v46 }
 0xc29   :  { %1378 = vpow2.f32 %v1302_v0 }
 0xc2f   :  { %v1379_v48 = vpop.eup %1378 }
 0xc30   :  { %v1192_v61 = vadd.f32 1.0, %v1379_v48 }
 0xc32   :  { %1380 = vrcp.f32 %v1192_v61  ;;  %v1204_v63 = vand.u32 2147483648, %v1192_v61  ;;  %vm1198_vm6 = vweird.f32 %v1192_v61  ;;  %v1202_v50 = vand.u32 2147483647, %v1192_v61 }
 0xc34   :  { %v1205_v49 = vor.u32 1.1754944e-38, %v1204_v63  ;;  %vm1203_vm8 = vcmp.eq.f32.partialorder %v1202_v50, 8.507059e+37 }
 0xc38   :  { %v1381_v62 = vpop.eup %1380 }
 0xc39   :  { %v1194_v57 = vmul.f32 %v1381_v62, %v1192_v61  ;;  %vm1199_vm2 = vweird.f32 %v1381_v62 }
 0xc3a   :  { %vm1200_vm7 = vmor %vm1198_vm6, %vm1199_vm2 }
 0xc3b   :  { %v1195_v8 = vsub.f32 1.0, %v1194_v57 }
 0xc3d   :  { %v1196_v43 = vmul.f32 %v1381_v62, %v1195_v8 }
 0xc3f   :  { %v1197_v44 = vadd.f32 %v1381_v62, %v1196_v43 }
 0xc41   :  { %v1201_v47 = vsel %vm1200_vm7, %v1381_v62, %v1197_v44 }
 0xc42   :  { %v1206_v11 = vsel %vm1203_vm8, %v1205_v49, %v1201_v47 }
 0xc43   :  { %v1219_v23 = vsub.f32 1.0, %v1206_v11 }
 0xc54   :  { %v1210_v16 = vpop.permute.xlu2 %1209 }
 0xc55   :  { %v1212_v15 = vmul.f32 %v1210_v16, %v1206_v11 }
 0xc57   :  { %1214 = vrot.lane.b32.xlu0 %v1212_v15, %s1546_s19 }
 0xc5c   :  { %v1226_v21 = vpop.permute.xlu2 %1225 }
 0xc5d   :  { %v1228_v26 = vmul.f32 %v1226_v21, %v1206_v11 }
 0xc5f   :  { %1233 = vrot.lane.b32.xlu0 %v1231_v13, %s1541_s11 }
 0xcc9   :  { %v1215_v17 = vpop.permute.xlu0 %1214 }
 0xcca   :  { %v1217_v19 = vadd.f32 %v1215_v17, %v1163_v22 }
 0xccc   :  { %1382 = vtanh.f32 %v1217_v19 }
 0xcd1   :  { %v1234_v53 = vpop.permute.xlu0 %1233 }
 0xcd2   :  { %v1383_v20 = vpop.eup %1382 }
 0xcd3   :  { %1221 = vrot.lane.b32.xlu1 %v1383_v20, %s1548_s1 }
 0xd45   :  { %v1222_v60 = vpop.permute.xlu1 %1221 }
 0xd46   :  { %v1224_v27 = vmul.f32 %v1222_v60, %v1219_v23 }
 0xd48   :  { %v1229_v28 = vadd.f32 %v1228_v26, %v1224_v27 }
 0xd4a   :  { %v1230_v29 = vmul.f32 %v1229_v28, %v1122_v14 }
 0xd4c   :  { %v1236_v18 = vadd.f32 %v1234_v53, %v1230_v29 }
 0xd4e   :  { %1238 = vrot.lane.b32.xlu1 %v1236_v18, %s1548_s1 }
 0xdc0   :  { %v1239_v31 = vpop.permute.xlu1 %1238 }
 0xdc1   :  { %1241 = vst.msk [vmem:[#allocation11 + $0x2] sm:$0x3] %vm136_vm0, %v1239_v31 }
 0xdc2   :  { %1254 = dma.vmem_to_hbm [thread:$0]  %s1247_s25, 64, %s1249_s6, [#allocation4], %s1541_s11, %s1541_s11, %s1542_s12  }
 0xdc3   :  { %1534 = dma.done.wait [#allocation4], 64  }
 0xdc4   :  { %1535 = vsyncadd [#allocation4], 4294967232 }
 0xdc5   :  { %1259 = vsyncpa [#allocation3], 1 }
 0xdc6   :  { %1260 = vsyncpa [#allocation6], 1 }
 0xdc7   :  { %1261 = vsyncpa [#allocation9], 1 }
 0xdc8   :  { %1262 = vsyncpa [#allocation4], 1 }

</bundles_post_ra>
